<compile_context>
chip_gen: v6e
topology: v6e:2x2x1
jax: 0.10.0
libtpu: 0.0.40
codegen_flags: <defaults>
</compile_context>

<pallas_src>
import functools

import jax
import jax.numpy as jnp
import numpy as np
from jax.experimental import pallas as pl
from jax.experimental.pallas import tpu as pltpu


# --------------------------------------------------------------------------
# Glue: fold3d.unfold3d + fold_utils.view_as_2d equivalent (pure reshaping).
# --------------------------------------------------------------------------
def unfold3d_patches_2d(video, patch_size):
    """video: [B, C, T, H, W] -> [L, C*pt*ph*pw]  (stride=1, no padding, B==1)."""
    B, C, T, H, W = video.shape
    pt, ph, pw = patch_size
    To, Ho, Wo = T - pt + 1, H - ph + 1, W - pw + 1
    slices = []
    for dt in range(pt):
        for dh in range(ph):
            for dw in range(pw):
                slices.append(video[:, :, dt:dt + To, dh:dh + Ho, dw:dw + Wo])
    p = jnp.stack(slices, axis=2)                      # [B, C, pt*ph*pw, To, Ho, Wo]
    p = p.reshape(B, C * pt * ph * pw, To * Ho * Wo)   # [B, d, L]
    return jnp.transpose(p[0], (1, 0))                 # [L, d]


def _cdiv(a, b):
    return -(-a // b)


def _round_up(x, m):
    return ((x + m - 1) // m) * m


# --------------------------------------------------------------------------
# Fused kernel: exact brute-force flat-L2 NN (k=1) + per-row squared distance.
#   grid = (result tiles i [parallel], valid tiles j [arbitrary/reduction]).
#   score_ij = ||v_j||^2 - <r_i, 2*v_j>   (||r_i||^2 added once at the end)
#   best_ref keeps the running per-row min over j; the output block is
#   i-indexed, so it stays VMEM-resident and is written only on the last j.
# --------------------------------------------------------------------------
def _nn_loss_kernel(r_ref, v_ref, vn_ref, rn_ref, out_ref, best_ref):
    j = pl.program_id(1)

    @pl.when(j == 0)
    def _():
        best_ref[...] = jnp.full_like(best_ref, jnp.inf)

    # (tm, tn) = r (tm, d) . (2v)^T (tn, d): bf16 operands, unpadded K = d,
    # f32 accumulation on the MXU.  The "2x" is pre-folded into v (exact).
    dots2 = jax.lax.dot_general(
        r_ref[...], v_ref[...], (((1,), (1,)), ((), ())),
        preferred_element_type=jnp.float32)

    # ||v_j||^2 is precomputed in f32 in the wrapper (hoisted out of the grid
    # loop); padded valid rows carry +inf there, which also masks them out of
    # the min — no iota / row-mask needed in the kernel.
    score = vn_ref[...] - dots2                              # (tm, tn), 1 VALU op/elem
    best_ref[...] = jnp.minimum(best_ref[...],
                                jnp.min(score, axis=1, keepdims=True))  # XLU lane-reduce

    @pl.when(j == pl.num_programs(1) - 1)
    def _():
        # per-row exact(-expansion) nearest-neighbor squared distance
        out_ref[...] = best_ref[...] + rn_ref[...]


def nn_min_sqdist(result_2d, valid_2d, tm_target=2048, tn_target=512):
    """Returns [M] f32: min_j ||r_i - v_j||^2 for every result patch i."""
    M, d = result_2d.shape
    N, d2 = valid_2d.shape
    assert d == d2

    # --- adaptive tiling -------------------------------------------------
    # tm: big result tile => the valid matrix is re-streamed only Mp/tm times
    #     (dominant HBM traffic) and grid steps carry lots of MXU work.
    # tn: multiple of 128 (vn lane dim), near tn_target, minimal N padding.
    n_i = max(1, _cdiv(M, tm_target))
    tm = _round_up(_cdiv(M, n_i), 8)
    n_j = max(1, _cdiv(N, tn_target))
    tn = _round_up(_cdiv(N, n_j), 128)

    # Crude VMEM estimate (double-buffered bf16 operand tiles in their padded
    # VMEM layout + f32 dots/score temporaries).  Keep well under the ~32 MiB
    # scoped-VMEM default (64 MiB physical on v7x).
    def _vmem_est(tm_, tn_):
        dp = _round_up(d, 128)
        return (2 * (tm_ + tn_) * dp * 2      # bf16 r/v tiles, double-buffered
                + 2 * tm_ * tn_ * 4           # dots + score f32 temporaries
                + 6 * tm_ * 4)                # best / rn / out columns
    while _vmem_est(tm, tn) > 18 * 1024 * 1024 and tm > 256:
        n_i *= 2
        tm = _round_up(_cdiv(M, n_i), 8)

    Mp = tm * n_i
    Np = tn * n_j

    r32 = result_2d.astype(jnp.float32)
    v32 = valid_2d.astype(jnp.float32)

    # Row norms hoisted out of the kernel, computed once in f32.
    rn = jnp.pad(jnp.sum(r32 * r32, axis=1, keepdims=True), ((0, Mp - M), (0, 0)))
    vn = jnp.pad(jnp.sum(v32 * v32, axis=1)[None, :], ((0, 0), (0, Np - N)),
                 constant_values=jnp.inf)                 # +inf masks padded rows

    # bf16 operands: single-pass MXU matmul + half the HBM traffic.  The
    # feature dim d is left unpadded (full-extent block), so neither streamed
    # bytes nor MXU contraction length get inflated to 128.  The factor 2 of
    # the cross term is folded into v (exact: power-of-two scale in bf16).
    r = jnp.pad(r32, ((0, Mp - M), (0, 0))).astype(jnp.bfloat16)
    v = jnp.pad(2.0 * v32, ((0, Np - N), (0, 0))).astype(jnp.bfloat16)

    out = pl.pallas_call(
        _nn_loss_kernel,
        out_shape=jax.ShapeDtypeStruct((Mp, 1), jnp.float32),
        grid_spec=pltpu.PrefetchScalarGridSpec(
            num_scalar_prefetch=0,
            grid=(n_i, n_j),
            in_specs=[
                pl.BlockSpec((tm, d), lambda i, j: (i, 0)),   # result tile (resident over j)
                pl.BlockSpec((tn, d), lambda i, j: (j, 0)),   # 2*valid tile (streamed reduction)
                pl.BlockSpec((1, tn), lambda i, j: (0, j)),   # ||v_j||^2, +inf padded
                pl.BlockSpec((tm, 1), lambda i, j: (i, 0)),   # ||r_i||^2
            ],
            out_specs=pl.BlockSpec((tm, 1), lambda i, j: (i, 0)),
            scratch_shapes=[pltpu.VMEM((tm, 1), jnp.float32)]),
        compiler_params=pltpu.CompilerParams(
            dimension_semantics=("parallel", "arbitrary")),
    )(r, v, vn, rn)
    return out[:M, 0]


def _nn_loss_forward(result, valid_2d, patch_size):
    result_2d = unfold3d_patches_2d(result, patch_size)          # [M, d]
    # MSELoss(reduction='sum')(r, v_nn) == sum_i min_j ||r_i - v_j||^2:
    # the faiss k=1 search, the F.embedding gather and the MSE sum collapse
    # into one fused Pallas kernel + a trivial final reduction.
    return jnp.sum(nn_min_sqdist(result_2d, valid_2d))


# --------------------------------------------------------------------------
# NNLoss module equivalent.
# --------------------------------------------------------------------------
class NNLossPallas:
    # TODO(synk): t/h/v flips, 'weighted_MSE'/'L1' losses, IVF (nlist/nprobe)
    # approximate search and save_NN_dist I/O are not wired up; defaults
    # (MSE, exact flat L2) only.  NN indices are never materialized.
    def __init__(self, valid_video, NN_patch_size=(1, 5, 5), loss_name="MSE"):
        assert loss_name == "MSE"
        self.NN_patch_size = NN_patch_size
        # extract_valid_patches_2d (no flips): [N, d]
        self.valid_patches_2d = unfold3d_patches_2d(valid_video, NN_patch_size)
        self._forward = jax.jit(
            functools.partial(_nn_loss_forward, patch_size=NN_patch_size))

    def __call__(self, result):
        return self._forward(result, self.valid_patches_2d)


if __name__ == "__main__":
    key = jax.random.PRNGKey(0)
    k1, k2 = jax.random.split(key)
    B, C, T, H, W = 1, 3, 4, 16, 16                      # small video, NCTHW
    valid_video = jax.random.normal(k1, (B, C, T, H, W), dtype=jnp.float32)
    result = jax.random.normal(k2, (B, C, T, H, W), dtype=jnp.float32)

    loss_mod = NNLossPallas(valid_video, NN_patch_size=(1, 5, 5), loss_name="MSE")
    loss = jax.block_until_ready(loss_mod(result))

    # pure-JAX reference (exact f32 squared-L2 NN + sum of squared differences)
    vp = unfold3d_patches_2d(valid_video, (1, 5, 5))
    rp = unfold3d_patches_2d(result, (1, 5, 5))
    ref_idx = jnp.argmin(jnp.sum((rp[:, None, :] - vp[None, :, :]) ** 2, -1), axis=1)
    ref_loss = jnp.sum((rp - vp[ref_idx]) ** 2)
    assert np.allclose(float(loss), float(ref_loss), rtol=2e-3), (float(loss), float(ref_loss))

    print("KERNEL_OK")
</pallas_src>

<mosaic_0001>
module attributes {stable_mosaic.version = 11 : i64} {
  func.func @_nn_loss_kernel(%arg0: i32, %arg1: i32, %arg2: memref<576x75xbf16, #tpu.memory_space<vmem>>, %arg3: memref<384x75xbf16, #tpu.memory_space<vmem>>, %arg4: memref<1x384xf32, #tpu.memory_space<vmem>>, %arg5: memref<576x1xf32, #tpu.memory_space<vmem>>, %arg6: memref<576x1xf32, #tpu.memory_space<vmem>>, %arg7: memref<576x1xf32, #tpu.memory_space<vmem>>) attributes {dimension_semantics = [#tpu.dimension_semantics<parallel>, #tpu.dimension_semantics<arbitrary>], iteration_bounds = array<i64: 1, 2>, scalar_prefetch = 0 : i64, scratch_operands = 1 : i64, tpu.core_type = #tpu.core_type<tc>, window_params = [{transform_indices = @transform_0, window_bounds = array<i64: 576, 75>}, {transform_indices = @transform_1, window_bounds = array<i64: 384, 75>}, {transform_indices = @transform_2, window_bounds = array<i64: 1, 384>}, {transform_indices = @transform_3, window_bounds = array<i64: 576, 1>}, {transform_indices = @transform_4, window_bounds = array<i64: 576, 1>}]} {
    %c0_i32 = arith.constant 0 : i32
    %0 = arith.cmpi eq, %arg1, %c0_i32 : i32
    %1 = arith.extui %0 : i1 to i32
    %c0_i32_0 = arith.constant 0 : i32
    %2 = arith.cmpi ne, %1, %c0_i32_0 : i32
    scf.if %2 {
      %cst_12 = arith.constant 0x7F800000 : f32
      %17 = vector.broadcast %cst_12 : f32 to vector<576x1xf32>
      %c0_13 = arith.constant 0 : index
      %c0_14 = arith.constant 0 : index
      %18 = vector.load %arg7[%c0_13, %c0_14] : memref<576x1xf32, #tpu.memory_space<vmem>>, vector<576x1xf32>
      tpu.vector_store %arg7[%c0_13, %c0_14], %17 {strides = array<i32>} : memref<576x1xf32, #tpu.memory_space<vmem>>, vector<576x1xf32>,
    } else {
    }
    %c0 = arith.constant 0 : index
    %c0_1 = arith.constant 0 : index
    %3 = vector.load %arg2[%c0, %c0_1] : memref<576x75xbf16, #tpu.memory_space<vmem>>, vector<576x75xbf16>
    %c0_2 = arith.constant 0 : index
    %c0_3 = arith.constant 0 : index
    %4 = vector.load %arg3[%c0_2, %c0_3] : memref<384x75xbf16, #tpu.memory_space<vmem>>, vector<384x75xbf16>
    %cst = arith.constant dense<0.000000e+00> : vector<576x384xf32>
    %5 = tpu.matmul %3, %4, %cst {dimension_numbers = #tpu.dot_dimension_numbers<[1], [1], [0], [0], [0, 0, 1, 0], [], []>} : vector<576x75xbf16>, vector<384x75xbf16>, vector<576x384xf32> -> vector<576x384xf32>
    %c0_4 = arith.constant 0 : index
    %c0_5 = arith.constant 0 : index
    %6 = vector.load %arg4[%c0_4, %c0_5] : memref<1x384xf32, #tpu.memory_space<vmem>>, vector<1x384xf32>
    %7 = vector.broadcast %6 : vector<1x384xf32> to vector<576x384xf32>
    %8 = arith.subf %7, %5 : vector<576x384xf32>
    %c0_6 = arith.constant 0 : index
    %c0_7 = arith.constant 0 : index
    %9 = vector.load %arg7[%c0_6, %c0_7] : memref<576x1xf32, #tpu.memory_space<vmem>>, vector<576x1xf32>
    %cst_8 = arith.constant dense<0x7F800000> : vector<576xf32>
    %10 = vector.multi_reduction <minimumf>, %8, %cst_8 [1] : vector<576x384xf32> to vector<576xf32>
    %11 = vector.shape_cast %10 : vector<576xf32> to vector<576x1xf32>
    %12 = arith.minimumf %9, %11 : vector<576x1xf32>
    %c0_9 = arith.constant 0 : index
    %c0_10 = arith.constant 0 : index
    %13 = vector.load %arg7[%c0_9, %c0_10] : memref<576x1xf32, #tpu.memory_space<vmem>>, vector<576x1xf32>
    tpu.vector_store %arg7[%c0_9, %c0_10], %12 {strides = array<i32>} : memref<576x1xf32, #tpu.memory_space<vmem>>, vector<576x1xf32>,
    %c1_i32 = arith.constant 1 : i32
    %14 = arith.cmpi eq, %arg1, %c1_i32 : i32
    %15 = arith.extui %14 : i1 to i32
    %c0_i32_11 = arith.constant 0 : i32
    %16 = arith.cmpi ne, %15, %c0_i32_11 : i32
    scf.if %16 {
      %c0_12 = arith.constant 0 : index
      %c0_13 = arith.constant 0 : index
      %17 = vector.load %arg7[%c0_12, %c0_13] : memref<576x1xf32, #tpu.memory_space<vmem>>, vector<576x1xf32>
      %c0_14 = arith.constant 0 : index
      %c0_15 = arith.constant 0 : index
      %18 = vector.load %arg5[%c0_14, %c0_15] : memref<576x1xf32, #tpu.memory_space<vmem>>, vector<576x1xf32>
      %19 = arith.addf %17, %18 : vector<576x1xf32>
      %c0_16 = arith.constant 0 : index
      %c0_17 = arith.constant 0 : index
      %20 = vector.load %arg6[%c0_16, %c0_17] : memref<576x1xf32, #tpu.memory_space<vmem>>, vector<576x1xf32>
      tpu.vector_store %arg6[%c0_16, %c0_17], %19 {strides = array<i32>} : memref<576x1xf32, #tpu.memory_space<vmem>>, vector<576x1xf32>,
    } else {
    }
    return
  }
  func.func @transform_0(%arg0: i32, %arg1: i32) -> (i32, i32) {
    %c0_i32 = arith.constant 0 : i32
    %c0_i32_0 = arith.constant 0 : i32
    return %arg0, %c0_i32 : i32, i32
  }
  func.func @transform_1(%arg0: i32, %arg1: i32) -> (i32, i32) {
    %c0_i32 = arith.constant 0 : i32
    %c0_i32_0 = arith.constant 0 : i32
    return %arg1, %c0_i32 : i32, i32
  }
  func.func @transform_2(%arg0: i32, %arg1: i32) -> (i32, i32) {
    %c0_i32 = arith.constant 0 : i32
    %c0_i32_0 = arith.constant 0 : i32
    return %c0_i32, %arg1 : i32, i32
  }
  func.func @transform_3(%arg0: i32, %arg1: i32) -> (i32, i32) {
    %c0_i32 = arith.constant 0 : i32
    %c0_i32_0 = arith.constant 0 : i32
    return %arg0, %c0_i32 : i32, i32
  }
  func.func @transform_4(%arg0: i32, %arg1: i32) -> (i32, i32) {
    %c0_i32 = arith.constant 0 : i32
    %c0_i32_0 = arith.constant 0 : i32
    return %arg0, %c0_i32 : i32, i32
  }
}

</mosaic_0001>

<bundles_post_ra>
// kernel: _nn_loss_forward.1
= control target key start
LH: loop header
LB: loop body
LE: loop exit
PB: predicated region body
PF: predicated region fallthrough
CT: control target
= control target key end

     0   :  { %s3340_s15 = smov 0   ;;  %s3342_s16 = smov 0   ;;  %s4938_s0 = inlined_call_operand.vmem [shape: bf16[576,75], index: 0, kind: input, shape index: {}]   ;;  %s4939_s1 = inlined_call_operand.vmem [shape: bf16[768,75], index: 1, kind: input, shape index: {}]   ;;  %s4940_s2 = inlined_call_operand.vmem [shape: f32[1,768], index: 2, kind: input, shape index: {}]   ;;  %s4941_s3 = inlined_call_operand.vmem [shape: f32[576,1], index: 3, kind: input, shape index: {}]   ;;  %s4942_s4 = inlined_call_operand.vmem [shape: f32[576,1], index: 4, kind: output, shape index: {}]  }
   0x1   :  { %s3344_s17 = smov 0  }
   0x2 LB: > { %s23_s18 = sadd.s32 1, %s3308_s16  ;;  %p2805_p0 = scmp.ge.s32.totalorder %s3312_s17, 1  ;;  %s3312_s17 = sphi %s3344_s17, %s14_s17   ;;  %s3308_s16 = sphi %s3342_s16, %s4952_s16   ;;  %s3304_s15 = sphi %s3340_s15, %s4951_s15  }
   0x3   : > { %p24_p1 = scmp.ge.s32.totalorder %s23_s18, 2  ;;  %p207_p2 = scmp.lt.s32.totalorder %s3312_s17, 3 }
   0x5   : > { %s4954_s18 = smov (%p24_p1, %s23_s18), 0  ;;  %p208_p3 = pnand %p2805_p0, %p207_p2 }
   0x7   : > { %211 = sbr.rel (%p208_p3) target bundleno = 751 (0x2ef), region = 36 }
   0xc   : > { %s253_s19 = smul.u32 48, %s3304_s15  ;;  %p2807_p6 = scmp.ne.s32.totalorder %s3304_s15, 0 }
   0xd   : > { %s259_s20 = smul.u32 3, %s3304_s15 }
   0xe   : > { %p254_p4 = scmp.lt.s32.totalorder %s253_s19, 95  ;;  %280 = sbr.rel (%p2807_p6) target bundleno = 56 (0x38), region = 40 }
   0xf   : > { %p260_p5 = scmp.lt.s32.totalorder %s259_s20, 5 }
  0x10   : > { %s4956_s19 = smov (!%p254_p4, %s253_s19), 95 }
  0x11   : > { %s4958_s20 = smov (!%p260_p5, %s259_s20), 5  ;;  %s2806_s21 = sshll.u32 %s4956_s19, 2 }
  0x12   : > { %s3367_s24 = scalar_lea.vmem %s4939_s1, %s2806_s21  ;;  %s262_s27 = scalar_lea.vmem %s4940_s2, %s4958_s20 }
  0x13   : > { %vm281_vm0 = vcmask 7168   ;;  %v3314_v0 = vmov inf  }
  0x14   : > { %282 = vst.msk [vmem:[#allocation2] sm:$0xff] %vm281_vm0, %v3314_v0  ;;  %283 = vst.msk [vmem:[#allocation2 + $0x8] sm:$0xff] %vm281_vm0, %v3314_v0 }
  0x15   : > { %284 = vst.msk [vmem:[#allocation2 + $0x10] sm:$0xff] %vm281_vm0, %v3314_v0  ;;  %285 = vst.msk [vmem:[#allocation2 + $0x18] sm:$0xff] %vm281_vm0, %v3314_v0 }
  0x16   : > { %286 = vst.msk [vmem:[#allocation2 + $0x20] sm:$0xff] %vm281_vm0, %v3314_v0  ;;  %287 = vst.msk [vmem:[#allocation2 + $0x28] sm:$0xff] %vm281_vm0, %v3314_v0 }
  0x17   : > { %288 = vst.msk [vmem:[#allocation2 + $0x30] sm:$0xff] %vm281_vm0, %v3314_v0  ;;  %289 = vst.msk [vmem:[#allocation2 + $0x38] sm:$0xff] %vm281_vm0, %v3314_v0 }
  0x18   : > { %290 = vst.msk [vmem:[#allocation2 + $0x40] sm:$0xff] %vm281_vm0, %v3314_v0  ;;  %291 = vst.msk [vmem:[#allocation2 + $0x48] sm:$0xff] %vm281_vm0, %v3314_v0 }
  0x19   : > { %292 = vst.msk [vmem:[#allocation2 + $0x50] sm:$0xff] %vm281_vm0, %v3314_v0  ;;  %293 = vst.msk [vmem:[#allocation2 + $0x58] sm:$0xff] %vm281_vm0, %v3314_v0 }
  0x1a   : > { %294 = vst.msk [vmem:[#allocation2 + $0x60] sm:$0xff] %vm281_vm0, %v3314_v0  ;;  %295 = vst.msk [vmem:[#allocation2 + $0x68] sm:$0xff] %vm281_vm0, %v3314_v0 }
  0x1b   : > { %296 = vst.msk [vmem:[#allocation2 + $0x70] sm:$0xff] %vm281_vm0, %v3314_v0  ;;  %297 = vst.msk [vmem:[#allocation2 + $0x78] sm:$0xff] %vm281_vm0, %v3314_v0 }
  0x1c   : > { %298 = vst.msk [vmem:[#allocation2 + $0x80] sm:$0xff] %vm281_vm0, %v3314_v0  ;;  %299 = vst.msk [vmem:[#allocation2 + $0x88] sm:$0xff] %vm281_vm0, %v3314_v0 }
  0x1d   : > { %300 = vst.msk [vmem:[#allocation2 + $0x90] sm:$0xff] %vm281_vm0, %v3314_v0  ;;  %301 = vst.msk [vmem:[#allocation2 + $0x98] sm:$0xff] %vm281_vm0, %v3314_v0 }
  0x1e   : > { %302 = vst.msk [vmem:[#allocation2 + $0xa0] sm:$0xff] %vm281_vm0, %v3314_v0  ;;  %303 = vst.msk [vmem:[#allocation2 + $0xa8] sm:$0xff] %vm281_vm0, %v3314_v0 }
  0x1f   : > { %304 = vst.msk [vmem:[#allocation2 + $0xb0] sm:$0xff] %vm281_vm0, %v3314_v0  ;;  %305 = vst.msk [vmem:[#allocation2 + $0xb8] sm:$0xff] %vm281_vm0, %v3314_v0 }
  0x20   : > { %306 = vst.msk [vmem:[#allocation2 + $0xc0] sm:$0xff] %vm281_vm0, %v3314_v0  ;;  %307 = vst.msk [vmem:[#allocation2 + $0xc8] sm:$0xff] %vm281_vm0, %v3314_v0 }
  0x21   : > { %308 = vst.msk [vmem:[#allocation2 + $0xd0] sm:$0xff] %vm281_vm0, %v3314_v0  ;;  %309 = vst.msk [vmem:[#allocation2 + $0xd8] sm:$0xff] %vm281_vm0, %v3314_v0 }
  0x22   : > { %310 = vst.msk [vmem:[#allocation2 + $0xe0] sm:$0xff] %vm281_vm0, %v3314_v0  ;;  %311 = vst.msk [vmem:[#allocation2 + $0xe8] sm:$0xff] %vm281_vm0, %v3314_v0 }
  0x23   : > { %312 = vst.msk [vmem:[#allocation2 + $0xf0] sm:$0xff] %vm281_vm0, %v3314_v0  ;;  %313 = vst.msk [vmem:[#allocation2 + $0xf8] sm:$0xff] %vm281_vm0, %v3314_v0 }
  0x24   : > { %314 = vst.msk [vmem:[#allocation2 + $0x100] sm:$0xff] %vm281_vm0, %v3314_v0  ;;  %315 = vst.msk [vmem:[#allocation2 + $0x108] sm:$0xff] %vm281_vm0, %v3314_v0 }
  0x25   : > { %316 = vst.msk [vmem:[#allocation2 + $0x110] sm:$0xff] %vm281_vm0, %v3314_v0  ;;  %317 = vst.msk [vmem:[#allocation2 + $0x118] sm:$0xff] %vm281_vm0, %v3314_v0 }
  0x26   : > { %318 = vst.msk [vmem:[#allocation2 + $0x120] sm:$0xff] %vm281_vm0, %v3314_v0  ;;  %319 = vst.msk [vmem:[#allocation2 + $0x128] sm:$0xff] %vm281_vm0, %v3314_v0 }
  0x27   : > { %320 = vst.msk [vmem:[#allocation2 + $0x130] sm:$0xff] %vm281_vm0, %v3314_v0  ;;  %321 = vst.msk [vmem:[#allocation2 + $0x138] sm:$0xff] %vm281_vm0, %v3314_v0 }
  0x28   : > { %322 = vst.msk [vmem:[#allocation2 + $0x140] sm:$0xff] %vm281_vm0, %v3314_v0  ;;  %323 = vst.msk [vmem:[#allocation2 + $0x148] sm:$0xff] %vm281_vm0, %v3314_v0 }
  0x29   : > { %324 = vst.msk [vmem:[#allocation2 + $0x150] sm:$0xff] %vm281_vm0, %v3314_v0  ;;  %325 = vst.msk [vmem:[#allocation2 + $0x158] sm:$0xff] %vm281_vm0, %v3314_v0 }
  0x2a   : > { %326 = vst.msk [vmem:[#allocation2 + $0x160] sm:$0xff] %vm281_vm0, %v3314_v0  ;;  %327 = vst.msk [vmem:[#allocation2 + $0x168] sm:$0xff] %vm281_vm0, %v3314_v0 }
  0x2b   : > { %328 = vst.msk [vmem:[#allocation2 + $0x170] sm:$0xff] %vm281_vm0, %v3314_v0  ;;  %329 = vst.msk [vmem:[#allocation2 + $0x178] sm:$0xff] %vm281_vm0, %v3314_v0 }
  0x2c   : > { %330 = vst.msk [vmem:[#allocation2 + $0x180] sm:$0xff] %vm281_vm0, %v3314_v0  ;;  %331 = vst.msk [vmem:[#allocation2 + $0x188] sm:$0xff] %vm281_vm0, %v3314_v0 }
  0x2d   : > { %332 = vst.msk [vmem:[#allocation2 + $0x190] sm:$0xff] %vm281_vm0, %v3314_v0  ;;  %333 = vst.msk [vmem:[#allocation2 + $0x198] sm:$0xff] %vm281_vm0, %v3314_v0 }
  0x2e   : > { %334 = vst.msk [vmem:[#allocation2 + $0x1a0] sm:$0xff] %vm281_vm0, %v3314_v0  ;;  %335 = vst.msk [vmem:[#allocation2 + $0x1a8] sm:$0xff] %vm281_vm0, %v3314_v0 }
  0x2f   : > { %336 = vst.msk [vmem:[#allocation2 + $0x1b0] sm:$0xff] %vm281_vm0, %v3314_v0  ;;  %337 = vst.msk [vmem:[#allocation2 + $0x1b8] sm:$0xff] %vm281_vm0, %v3314_v0 }
  0x30   : > { %338 = vst.msk [vmem:[#allocation2 + $0x1c0] sm:$0xff] %vm281_vm0, %v3314_v0  ;;  %339 = vst.msk [vmem:[#allocation2 + $0x1c8] sm:$0xff] %vm281_vm0, %v3314_v0 }
  0x31   : > { %340 = vst.msk [vmem:[#allocation2 + $0x1d0] sm:$0xff] %vm281_vm0, %v3314_v0  ;;  %341 = vst.msk [vmem:[#allocation2 + $0x1d8] sm:$0xff] %vm281_vm0, %v3314_v0 }
  0x32   : > { %342 = vst.msk [vmem:[#allocation2 + $0x1e0] sm:$0xff] %vm281_vm0, %v3314_v0  ;;  %343 = vst.msk [vmem:[#allocation2 + $0x1e8] sm:$0xff] %vm281_vm0, %v3314_v0 }
  0x33   : > { %344 = vst.msk [vmem:[#allocation2 + $0x1f0] sm:$0xff] %vm281_vm0, %v3314_v0  ;;  %345 = vst.msk [vmem:[#allocation2 + $0x1f8] sm:$0xff] %vm281_vm0, %v3314_v0 }
  0x34   : > { %346 = vst.msk [vmem:[#allocation2 + $0x200] sm:$0xff] %vm281_vm0, %v3314_v0  ;;  %347 = vst.msk [vmem:[#allocation2 + $0x208] sm:$0xff] %vm281_vm0, %v3314_v0 }
  0x35   : > { %348 = vst.msk [vmem:[#allocation2 + $0x210] sm:$0xff] %vm281_vm0, %v3314_v0  ;;  %349 = vst.msk [vmem:[#allocation2 + $0x218] sm:$0xff] %vm281_vm0, %v3314_v0 }
  0x36   : > { %350 = vst.msk [vmem:[#allocation2 + $0x220] sm:$0xff] %vm281_vm0, %v3314_v0  ;;  %351 = vst.msk [vmem:[#allocation2 + $0x228] sm:$0xff] %vm281_vm0, %v3314_v0 }
  0x37   : > { %352 = vst.msk [vmem:[#allocation2 + $0x230] sm:$0xff] %vm281_vm0, %v3314_v0  ;;  %353 = vst.msk [vmem:[#allocation2 + $0x238] sm:$0xff] %vm281_vm0, %v3314_v0 }
  0x38 PF: > { %v3230_v1 = vld [vmem:[%s3367_s24 + $0x78] sm:$0xff]   ;;  %vm774_vm1 = vcmask 613376   ;;  %v3232_v3 = vld [vmem:[%s3367_s24 + $0x70] sm:$0xff]   ;;  %v3234_v7 = vld [vmem:[%s3367_s24 + $0x68] sm:$0xff]   ;;  %vm2334_vm2 = vcmask 7168   ;;  %p2940_p7 = scmp.ne.s32.totalorder %s3304_s15, 1 }
  0x39   : > { %v3231_v2 = vld [vmem:[%s3367_s24 + $0x38] sm:$0xff]   ;;  %3181 = vmatprep.subr.msk.bf16.mxu0 %vm774_vm1, %v3230_v1  ;;  %3182 = vmatprep.subr.msk.bf16.mxu1 %vm774_vm1, %v3230_v1  ;;  %v3233_v5 = vld [vmem:[%s3367_s24 + $0x30] sm:$0xff]   ;;  %v3235_v8 = vld [vmem:[%s3367_s24 + $0x28] sm:$0xff]  }
  0x3a   : > { %v905_v4 = vsel %vm774_vm1, %v3231_v2, 0  ;;  %v902_v6 = vsel %vm774_vm1, %v3233_v5, 0  ;;  %v3236_v9 = vld [vmem:[%s3367_s24 + $0x60] sm:$0xff]   ;;  %v899_v11 = vsel %vm774_vm1, %v3235_v8, 0  ;;  %v3542_v12 = vld [vmem:[%s4938_s0 + $0xd8] sm:$0xff]   ;;  %v3240_v18 = vld [vmem:[%s3367_s24 + $0x50] sm:$0xff]  }
  0x3b   : > { %2946 = vmatpush3.bf16.xpose.msra.mxu0 %v905_v4  ;;  %3173 = vmatpush3.bf16.xpose.msra.mxu1 %v905_v4  ;;  %v3536_v10 = vld [vmem:[%s4938_s0] sm:$0xff]   ;;  %v3238_v15 = vld [vmem:[%s3367_s24 + $0x58] sm:$0xff]   ;;  %v3241_v19 = vld [vmem:[%s3367_s24 + $0x10] sm:$0xff]  }
  0x3c   : > { %3183 = vmatprep.subr.msk.bf16.mxu0 %vm774_vm1, %v3232_v3  ;;  %3184 = vmatprep.subr.msk.bf16.mxu1 %vm774_vm1, %v3232_v3  ;;  %v3237_v13 = vld [vmem:[%s3367_s24 + $0x20] sm:$0xff]   ;;  %v3239_v16 = vld [vmem:[%s3367_s24 + $0x18] sm:$0xff]   ;;  %v890_v20 = vsel %vm774_vm1, %v3241_v19, 0  ;;  %v3242_v21 = vld [vmem:[%s3367_s24 + $0x48] sm:$0xff]  }
  0x3d   : > { %2961 = vmatprep.mubr.msk.bf16.mxu0 %vm774_vm1, %v3536_v10  ;;  %3015 = vmatprep.mubr.msk.bf16.mxu1 %vm774_vm1, %v3542_v12  ;;  %v896_v14 = vsel %vm774_vm1, %v3237_v13, 0  ;;  %v893_v17 = vsel %vm774_vm1, %v3239_v16, 0  ;;  %v3243_v22 = vld [vmem:[%s3367_s24 + $0x8] sm:$0xff]   ;;  %v3244_v24 = vld [vmem:[%s3367_s24 + $0x40] sm:$0xff]   ;;  %v3248_v27 = vld [vmem:[%s3367_s24 + $0xb8] sm:$0xff]  }
  0x3e   : > { %v887_v23 = vsel %vm774_vm1, %v3243_v22, 0  ;;  %v3245_v25 = vld [vmem:[%s3367_s24] sm:$0xff]   ;;  %v3577_v28 = vld [vmem:[%s4938_s0 + $0x8] sm:$0xff]   ;;  %v953_v29 = vsel %vm774_vm1, %v3248_v27, 0  ;;  %v3251_v31 = vld [vmem:[%s3367_s24 + $0xb0] sm:$0xff]  }
  0x3f   : > { %v884_v26 = vsel %vm774_vm1, %v3245_v25, 0  ;;  %v3583_v30 = vld [vmem:[%s4938_s0 + $0xe0] sm:$0xff]   ;;  %v3598_v32 = vld [vmem:[%s4938_s0 + $0x10] sm:$0xff]   ;;  %v950_v33 = vsel %vm774_vm1, %v3251_v31, 0  ;;  %v3604_v34 = vld [vmem:[%s4938_s0 + $0xe8] sm:$0xff]  }
  0x40   : > { %v3254_v35 = vld [vmem:[%s3367_s24 + $0xa8] sm:$0xff]   ;;  %v3619_v36 = vld [vmem:[%s4938_s0 + $0x18] sm:$0xff]   ;;  %v3625_v38 = vld [vmem:[%s4938_s0 + $0xf0] sm:$0xff]  }
  0x41   : > { %v947_v37 = vsel %vm774_vm1, %v3254_v35, 0  ;;  %v3257_v39 = vld [vmem:[%s3367_s24 + $0xa0] sm:$0xff]   ;;  %v3644_v42 = vld [vmem:[%s4938_s0 + $0xf8] sm:$0xff]   ;;  %v3261_v44 = vld [vmem:[%s4938_s0 + $0x28] sm:$0xff]  }
  0x42   : > { %v3258_v40 = vld [vmem:[%s4938_s0 + $0x20] sm:$0xff]   ;;  %v944_v41 = vsel %vm774_vm1, %v3257_v39, 0  ;;  %v3260_v43 = vld [vmem:[%s3367_s24 + $0x98] sm:$0xff]   ;;  %v3263_v47 = vld [vmem:[%s3367_s24 + $0x90] sm:$0xff]  }
  0x43   : > { %2948 = vmatpush3.bf16.xpose.msra.mxu0 %v902_v6  ;;  %3174 = vmatpush3.bf16.xpose.msra.mxu1 %v902_v6  ;;  %v941_v45 = vsel %vm774_vm1, %v3260_v43, 0  ;;  %v3662_v46 = vld [vmem:[%s4938_s0 + $0x100] sm:$0xff]   ;;  %v3264_v48 = vld [vmem:[%s4938_s0 + $0x30] sm:$0xff]   ;;  %v938_v49 = vsel %vm774_vm1, %v3263_v47, 0  ;;  %v3679_v50 = vld [vmem:[%s4938_s0 + $0x108] sm:$0xff]  }
  0x44   : > { %3185 = vmatprep.subr.msk.bf16.mxu0 %vm774_vm1, %v3234_v7  ;;  %3186 = vmatprep.subr.msk.bf16.mxu1 %vm774_vm1, %v3234_v7  ;;  %v3266_v51 = vld [vmem:[%s3367_s24 + $0x88] sm:$0xff]   ;;  %v3267_v52 = vld [vmem:[%s4938_s0 + $0x38] sm:$0xff]   ;;  %v3695_v53 = vld [vmem:[%s4938_s0 + $0x110] sm:$0xff]  }
  0x45   : > { %v935_v54 = vsel %vm774_vm1, %v3266_v51, 0  ;;  %v3271_v55 = vld [vmem:[%s3367_s24 + $0x80] sm:$0xff]   ;;  %v3712_v57 = vld [vmem:[%s4938_s0 + $0x118] sm:$0xff]   ;;  %v3272_v59 = vld [vmem:[%s4938_s0 + $0x48] sm:$0xff]  }
  0x46   : > { %v3269_v56 = vld [vmem:[%s4938_s0 + $0x40] sm:$0xff]   ;;  %v932_v58 = vsel %vm774_vm1, %v3271_v55, 0  ;;  %v3273_v60 = vld [vmem:[%s4938_s0 + $0x50] sm:$0xff]   ;;  %v3274_v61 = vld [vmem:[%s4938_s0 + $0x58] sm:$0xff]  }
  0x47   : > { %v3275_v62 = vld [vmem:[%s4938_s0 + $0x60] sm:$0xff]   ;;  %v3276_v63 = vld [vmem:[%s4938_s0 + $0x68] sm:$0xff]   ;;  %v3277_v0 = vld [vmem:[%s4938_s0 + $0x70] sm:$0xff]  }
  0x48   : > { %v3278_v1 = vld [vmem:[%s4938_s0 + $0x78] sm:$0xff]   ;;  %v3279_v2 = vld [vmem:[%s4938_s0 + $0x80] sm:$0xff]   ;;  %v3280_v3 = vld [vmem:[%s4938_s0 + $0x88] sm:$0xff]  }
  0x49   : > { %v3281_v4 = vld [vmem:[%s4938_s0 + $0x90] sm:$0xff]   ;;  %v3282_v5 = vld [vmem:[%s4938_s0 + $0x98] sm:$0xff]   ;;  %v3283_v6 = vld [vmem:[%s4938_s0 + $0xa0] sm:$0xff]  }
  0x4a   : > { %v3284_v7 = vld [vmem:[%s4938_s0 + $0xa8] sm:$0xff]   ;;  %v3285_v8 = vld [vmem:[%s4938_s0 + $0xb0] sm:$0xff]  }
  0x4b   : > { %2950 = vmatpush3.bf16.xpose.msra.mxu0 %v899_v11  ;;  %3175 = vmatpush3.bf16.xpose.msra.mxu1 %v899_v11  ;;  %v3288_v11 = vld [vmem:[%s4938_s0 + $0xc8] sm:$0xff]   ;;  %v3289_v13 = vld [vmem:[%s4938_s0 + $0xd0] sm:$0xff]  }
  0x4c   : > { %3187 = vmatprep.subr.msk.bf16.mxu0 %vm774_vm1, %v3236_v9  ;;  %3188 = vmatprep.subr.msk.bf16.mxu1 %vm774_vm1, %v3236_v9  ;;  %v3286_v9 = vld [vmem:[%s4938_s0 + $0xb8] sm:$0xff]  }
  0x53   : > { %2952 = vmatpush3.bf16.xpose.msra.mxu0 %v896_v14  ;;  %3176 = vmatpush3.bf16.xpose.msra.mxu1 %v896_v14  ;;  %v1671_v14 = vlaneseq }
  0x54   : > { %3189 = vmatprep.subr.msk.bf16.mxu0 %vm774_vm1, %v3238_v15  ;;  %3190 = vmatprep.subr.msk.bf16.mxu1 %vm774_vm1, %v3238_v15 }
  0x55   : > { %v3842_v15 = vshrl.u32 %v1671_v14, 7 }
  0x57   : > { %v1677_v16 = vsub.s32 1, %v3842_v15 }
  0x5b   : > { %2954 = vmatpush3.bf16.xpose.msra.mxu0 %v893_v17  ;;  %3177 = vmatpush3.bf16.xpose.msra.mxu1 %v893_v17  ;;  %v3857_v17 = vld [vmem:[%s262_s27] sm:$0x7] }
  0x5c   : > { %3191 = vmatprep.subr.msk.bf16.mxu0 %vm774_vm1, %v3240_v18  ;;  %3192 = vmatprep.subr.msk.bf16.mxu1 %vm774_vm1, %v3240_v18  ;;  %v3863_v19 = vrot.slane %v3857_v17, %v1677_v16 }
  0x63   : > { %2956 = vmatpush3.bf16.xpose.msra.mxu0 %v890_v20  ;;  %3178 = vmatpush3.bf16.xpose.msra.mxu1 %v890_v20 }
  0x64   : > { %3193 = vmatprep.subr.msk.bf16.mxu0 %vm774_vm1, %v3242_v21  ;;  %3194 = vmatprep.subr.msk.bf16.mxu1 %vm774_vm1, %v3242_v21 }
  0x6b   : > { %2958 = vmatpush3.bf16.xpose.msra.mxu0 %v887_v23  ;;  %3179 = vmatpush3.bf16.xpose.msra.mxu1 %v887_v23 }
  0x6c   : > { %3195 = vmatprep.subr.msk.bf16.mxu0 %vm774_vm1, %v3244_v24  ;;  %3196 = vmatprep.subr.msk.bf16.mxu1 %vm774_vm1, %v3244_v24 }
  0x73   : > { %2960 = vmatpush3.bf16.xpose.msra.mxu0 %v884_v26  ;;  %3180 = vmatpush3.bf16.xpose.msra.mxu1 %v884_v26 }
  0x74   : > { %3197 = vmatprep.subr.msk.bf16.mxu1 %vm774_vm1, %v3248_v27 }
  0x7a   : > { %2962 = vmatmul.mubr.msk.bf16.vlgmr.msra.gmra.mxu0 %vm774_vm1, %v3536_v10  ;;  %3016 = vmatmul.mubr.msk.bf16.vlgmr.msra.gmra.mxu1 %vm774_vm1, %v3542_v12 }
  0x7b   : > { %3078 = vmatpush3.bf16.xpose.msra.mxu1 %v953_v29  ;;  %2963 = vmatprep.mubr.msk.bf16.mxu0 %vm774_vm1, %v3577_v28 }
  0x7c   : > { %3017 = vmatprep.mubr.msk.bf16.mxu1 %vm774_vm1, %v3583_v30  ;;  %3198 = vmatprep.subr.msk.bf16.mxu1 %vm774_vm1, %v3251_v31 }
  0x82   : > { %2964 = vmatmul.mubr.msk.bf16.gmra.mxu0 %vm774_vm1, %v3577_v28  ;;  %3018 = vmatmul.mubr.msk.bf16.gmra.mxu1 %vm774_vm1, %v3583_v30 }
  0x83   : > { %3080 = vmatpush3.bf16.xpose.msra.mxu1 %v950_v33  ;;  %2965 = vmatprep.mubr.msk.bf16.mxu0 %vm774_vm1, %v3598_v32 }
  0x84   : > { %3019 = vmatprep.mubr.msk.bf16.mxu1 %vm774_vm1, %v3604_v34  ;;  %3199 = vmatprep.subr.msk.bf16.mxu1 %vm774_vm1, %v3254_v35 }
  0x8a   : > { %2966 = vmatmul.mubr.msk.bf16.gmra.mxu0 %vm774_vm1, %v3598_v32  ;;  %3020 = vmatmul.mubr.msk.bf16.gmra.mxu1 %vm774_vm1, %v3604_v34 }
  0x8b   : > { %3082 = vmatpush3.bf16.xpose.msra.mxu1 %v947_v37  ;;  %2967 = vmatprep.mubr.msk.bf16.mxu0 %vm774_vm1, %v3619_v36 }
  0x8c   : > { %3021 = vmatprep.mubr.msk.bf16.mxu1 %vm774_vm1, %v3625_v38  ;;  %3200 = vmatprep.subr.msk.bf16.mxu1 %vm774_vm1, %v3257_v39 }
  0x92   : > { %2968 = vmatmul.mubr.msk.bf16.gmra.mxu0 %vm774_vm1, %v3619_v36  ;;  %3022 = vmatmul.mubr.msk.bf16.gmra.mxu1 %vm774_vm1, %v3625_v38 }
  0x93   : > { %3084 = vmatpush3.bf16.xpose.msra.mxu1 %v944_v41  ;;  %2969 = vmatprep.mubr.msk.bf16.mxu0 %vm774_vm1, %v3258_v40 }
  0x94   : > { %3023 = vmatprep.mubr.msk.bf16.mxu1 %vm774_vm1, %v3644_v42  ;;  %3201 = vmatprep.subr.msk.bf16.mxu1 %vm774_vm1, %v3260_v43 }
  0x9a   : > { %2970 = vmatmul.mubr.msk.bf16.gmra.mxu0 %vm774_vm1, %v3258_v40  ;;  %3024 = vmatmul.mubr.msk.bf16.gmra.mxu1 %vm774_vm1, %v3644_v42 }
  0x9b   : > { %3086 = vmatpush3.bf16.xpose.msra.mxu1 %v941_v45  ;;  %2971 = vmatprep.mubr.msk.bf16.mxu0 %vm774_vm1, %v3261_v44 }
  0x9c   : > { %3025 = vmatprep.mubr.msk.bf16.mxu1 %vm774_vm1, %v3662_v46  ;;  %3202 = vmatprep.subr.msk.bf16.mxu1 %vm774_vm1, %v3263_v47 }
  0xa2   : > { %2972 = vmatmul.mubr.msk.bf16.gmra.mxu0 %vm774_vm1, %v3261_v44  ;;  %3026 = vmatmul.mubr.msk.bf16.gmra.mxu1 %vm774_vm1, %v3662_v46 }
  0xa3   : > { %3088 = vmatpush3.bf16.xpose.msra.mxu1 %v938_v49  ;;  %2973 = vmatprep.mubr.msk.bf16.mxu0 %vm774_vm1, %v3264_v48 }
  0xa4   : > { %3027 = vmatprep.mubr.msk.bf16.mxu1 %vm774_vm1, %v3679_v50  ;;  %3203 = vmatprep.subr.msk.bf16.mxu1 %vm774_vm1, %v3266_v51 }
  0xaa   : > { %2974 = vmatmul.mubr.msk.bf16.gmra.mxu0 %vm774_vm1, %v3264_v48  ;;  %3028 = vmatmul.mubr.msk.bf16.gmra.mxu1 %vm774_vm1, %v3679_v50 }
  0xab   : > { %2975 = vmatprep.mubr.msk.bf16.mxu0 %vm774_vm1, %v3267_v52  ;;  %3029 = vmatprep.mubr.msk.bf16.mxu1 %vm774_vm1, %v3695_v53 }
  0xac   : > { %3090 = vmatpush3.bf16.xpose.msra.mxu1 %v935_v54 }
  0xad   : > { %3204 = vmatprep.subr.msk.bf16.mxu1 %vm774_vm1, %v3271_v55 }
  0xb2   : > { %2976 = vmatmul.mubr.msk.bf16.gmra.mxu0 %vm774_vm1, %v3267_v52  ;;  %3030 = vmatmul.mubr.msk.bf16.gmra.mxu1 %vm774_vm1, %v3695_v53 }
  0xb3   : > { %2977 = vmatprep.mubr.msk.bf16.mxu0 %vm774_vm1, %v3269_v56  ;;  %3031 = vmatprep.mubr.msk.bf16.mxu1 %vm774_vm1, %v3712_v57 }
  0xb4   : > { %3092 = vmatpush3.bf16.xpose.msra.mxu1 %v932_v58 }
  0xba   : > { %2978 = vmatmul.mubr.msk.bf16.gmra.mxu0 %vm774_vm1, %v3269_v56  ;;  %3032 = vmatmul.mubr.msk.bf16.gmra.mxu1 %vm774_vm1, %v3712_v57 }
  0xbb   : > { %2979 = vmatprep.mubr.msk.bf16.mxu0 %vm774_vm1, %v3272_v59  ;;  %3093 = vmatprep.mubr.msk.bf16.mxu1 %vm774_vm1, %v3536_v10  ;;  %v3287_v10 = vld [vmem:[%s4938_s0 + $0xc0] sm:$0xff]  }
  0xc2   : > { %2980 = vmatmul.mubr.msk.bf16.gmra.mxu0 %vm774_vm1, %v3272_v59  ;;  %3094 = vmatmul.mubr.msk.bf16.vlgmr.msra.gmra.mxu1 %vm774_vm1, %v3577_v28 }
  0xc3   : > { %2981 = vmatprep.mubr.msk.bf16.mxu0 %vm774_vm1, %v3273_v60  ;;  %3097 = vmatprep.mubr.msk.bf16.mxu1 %vm774_vm1, %v3598_v32 }
  0xca   : > { %2982 = vmatmul.mubr.msk.bf16.gmra.mxu0 %vm774_vm1, %v3273_v60  ;;  %3098 = vmatmul.mubr.msk.bf16.gmra.mxu1 %vm774_vm1, %v3619_v36 }
  0xcb   : > { %2983 = vmatprep.mubr.msk.bf16.mxu0 %vm774_vm1, %v3274_v61  ;;  %3101 = vmatprep.mubr.msk.bf16.mxu1 %vm774_vm1, %v3258_v40 }
  0xd2   : > { %2984 = vmatmul.mubr.msk.bf16.gmra.mxu0 %vm774_vm1, %v3274_v61  ;;  %3102 = vmatmul.mubr.msk.bf16.gmra.mxu1 %vm774_vm1, %v3261_v44 }
  0xd3   : > { %2985 = vmatprep.mubr.msk.bf16.mxu0 %vm774_vm1, %v3275_v62  ;;  %3105 = vmatprep.mubr.msk.bf16.mxu1 %vm774_vm1, %v3264_v48 }
  0xda   : > { %2986 = vmatmul.mubr.msk.bf16.gmra.mxu0 %vm774_vm1, %v3275_v62  ;;  %3106 = vmatmul.mubr.msk.bf16.gmra.mxu1 %vm774_vm1, %v3267_v52 }
  0xdb   : > { %2987 = vmatprep.mubr.msk.bf16.mxu0 %vm774_vm1, %v3276_v63  ;;  %3109 = vmatprep.mubr.msk.bf16.mxu1 %vm774_vm1, %v3269_v56 }
  0xe2   : > { %2988 = vmatmul.mubr.msk.bf16.gmra.mxu0 %vm774_vm1, %v3276_v63  ;;  %3110 = vmatmul.mubr.msk.bf16.gmra.mxu1 %vm774_vm1, %v3272_v59 }
  0xe3   : > { %2989 = vmatprep.mubr.msk.bf16.mxu0 %vm774_vm1, %v3277_v0  ;;  %3113 = vmatprep.mubr.msk.bf16.mxu1 %vm774_vm1, %v3273_v60 }
  0xea   : > { %2990 = vmatmul.mubr.msk.bf16.gmra.mxu0 %vm774_vm1, %v3277_v0  ;;  %3114 = vmatmul.mubr.msk.bf16.gmra.mxu1 %vm774_vm1, %v3274_v61 }
  0xeb   : > { %2991 = vmatprep.mubr.msk.bf16.mxu0 %vm774_vm1, %v3278_v1  ;;  %3117 = vmatprep.mubr.msk.bf16.mxu1 %vm774_vm1, %v3275_v62 }
  0xf2   : > { %2992 = vmatmul.mubr.msk.bf16.gmra.mxu0 %vm774_vm1, %v3278_v1  ;;  %3118 = vmatmul.mubr.msk.bf16.gmra.mxu1 %vm774_vm1, %v3276_v63 }
  0xf3   : > { %2993 = vmatprep.mubr.msk.bf16.mxu0 %vm774_vm1, %v3279_v2  ;;  %3121 = vmatprep.mubr.msk.bf16.mxu1 %vm774_vm1, %v3277_v0 }
  0xfa   : > { %2994 = vmatmul.mubr.msk.bf16.gmra.mxu0 %vm774_vm1, %v3279_v2  ;;  %3122 = vmatmul.mubr.msk.bf16.gmra.mxu1 %vm774_vm1, %v3278_v1 }
  0xfb   : > { %2995 = vmatprep.mubr.msk.bf16.mxu0 %vm774_vm1, %v3280_v3  ;;  %3125 = vmatprep.mubr.msk.bf16.mxu1 %vm774_vm1, %v3279_v2 }
 0x102   : > { %2996 = vmatmul.mubr.msk.bf16.gmra.mxu0 %vm774_vm1, %v3280_v3  ;;  %3126 = vmatmul.mubr.msk.bf16.gmra.mxu1 %vm774_vm1, %v3280_v3 }
 0x103   : > { %2997 = vmatprep.mubr.msk.bf16.mxu0 %vm774_vm1, %v3281_v4  ;;  %3129 = vmatprep.mubr.msk.bf16.mxu1 %vm774_vm1, %v3281_v4 }
 0x10a   : > { %2998 = vmatmul.mubr.msk.bf16.gmra.mxu0 %vm774_vm1, %v3281_v4  ;;  %3130 = vmatmul.mubr.msk.bf16.gmra.mxu1 %vm774_vm1, %v3282_v5 }
 0x10b   : > { %2999 = vmatprep.mubr.msk.bf16.mxu0 %vm774_vm1, %v3282_v5  ;;  %3133 = vmatprep.mubr.msk.bf16.mxu1 %vm774_vm1, %v3283_v6 }
 0x112   : > { %3000 = vmatmul.mubr.msk.bf16.gmra.mxu0 %vm774_vm1, %v3282_v5  ;;  %3134 = vmatmul.mubr.msk.bf16.gmra.mxu1 %vm774_vm1, %v3284_v7 }
 0x113   : > { %3001 = vmatprep.mubr.msk.bf16.mxu0 %vm774_vm1, %v3283_v6  ;;  %3137 = vmatprep.mubr.msk.bf16.mxu1 %vm774_vm1, %v3285_v8 }
 0x11a   : > { %3002 = vmatmul.mubr.msk.bf16.gmra.mxu0 %vm774_vm1, %v3283_v6  ;;  %3138 = vmatmul.mubr.msk.bf16.gmra.mxu1 %vm774_vm1, %v3286_v9 }
 0x11b   : > { %3003 = vmatprep.mubr.msk.bf16.mxu0 %vm774_vm1, %v3284_v7  ;;  %3141 = vmatprep.mubr.msk.bf16.mxu1 %vm774_vm1, %v3287_v10 }
 0x122   : > { %3004 = vmatmul.mubr.msk.bf16.gmra.mxu0 %vm774_vm1, %v3284_v7  ;;  %3142 = vmatmul.mubr.msk.bf16.gmra.mxu1 %vm774_vm1, %v3288_v11 }
 0x123   : > { %3005 = vmatprep.mubr.msk.bf16.mxu0 %vm774_vm1, %v3285_v8  ;;  %3145 = vmatprep.mubr.msk.bf16.mxu1 %vm774_vm1, %v3289_v13 }
 0x12a   : > { %3006 = vmatmul.mubr.msk.bf16.gmra.mxu0 %vm774_vm1, %v3285_v8  ;;  %3146 = vmatmul.mubr.msk.bf16.gmra.mxu1 %vm774_vm1, %v3542_v12  ;;  %v1673_v12 = vsub.s32 0, %v3842_v15 }
 0x12b   : > { %3007 = vmatprep.mubr.msk.bf16.mxu0 %vm774_vm1, %v3286_v9  ;;  %3149 = vmatprep.mubr.msk.bf16.mxu1 %vm774_vm1, %v3583_v30 }
 0x12c   : > { %v3860_v18 = vrot.slane %v3857_v17, %v1673_v12 }
 0x132   : > { %3008 = vmatmul.mubr.msk.bf16.gmra.mxu0 %vm774_vm1, %v3286_v9  ;;  %3150 = vmatmul.mubr.msk.bf16.gmra.mxu1 %vm774_vm1, %v3604_v34 }
 0x133   : > { %3009 = vmatprep.mubr.msk.bf16.mxu0 %vm774_vm1, %v3287_v10  ;;  %3153 = vmatprep.mubr.msk.bf16.mxu1 %vm774_vm1, %v3625_v38 }
 0x13a   : > { %v989_v20 = vpop.f32.mrf.mxu0  ;;  %3010 = vmatmul.mubr.msk.bf16.gmra.mxu0 %vm774_vm1, %v3287_v10  ;;  %v1259_v21 = vpop.f32.mrf.mxu1  ;;  %3154 = vmatmul.mubr.msk.bf16.gmra.mxu1 %vm774_vm1, %v3644_v42 }
 0x13b   : > { %3011 = vmatprep.mubr.msk.bf16.mxu0 %vm774_vm1, %v3288_v11  ;;  %3157 = vmatprep.mubr.msk.bf16.mxu1 %vm774_vm1, %v3662_v46  ;;  %v1686_v24 = vsub.f32 %v3860_v18, %v989_v20  ;;  %v1848_v25 = vsub.f32 %v3860_v18, %v1259_v21 }
 0x13c   : > { %v991_v22 = vpop.f32.mrf.mxu0  ;;  %v1261_v23 = vpop.f32.mrf.mxu1 }
 0x13d   : > { %v1687_v26 = vsub.f32 %v3863_v19, %v991_v22  ;;  %v1849_v27 = vsub.f32 %v3863_v19, %v1261_v23 }
 0x13e   : > { %v993_v28 = vpop.f32.mrf.mxu0  ;;  %v1263_v29 = vpop.f32.mrf.mxu1 }
 0x13f   : > { %v3875_v30 = vmin.f32 %v1848_v25, %v1849_v27  ;;  %v3877_v31 = vmin.f32 %v1686_v24, %v1687_v26  ;;  %v1689_v34 = vsub.f32 %v3860_v18, %v993_v28  ;;  %v1851_v35 = vsub.f32 %v3860_v18, %v1263_v29 }
 0x140   : > { %v995_v32 = vpop.f32.mrf.mxu0  ;;  %v1265_v33 = vpop.f32.mrf.mxu1 }
 0x141   : > { %v1690_v36 = vsub.f32 %v3863_v19, %v995_v32  ;;  %v1852_v37 = vsub.f32 %v3863_v19, %v1265_v33 }
 0x142   : > { %v3883_v38 = vpop.f32.mrf.mxu0  ;;  %3012 = vmatmul.mubr.msk.bf16.gmra.mxu0 %vm774_vm1, %v3288_v11  ;;  %v1269_v39 = vpop.f32.mrf.mxu1  ;;  %3158 = vmatmul.mubr.msk.bf16.gmra.mxu1 %vm774_vm1, %v3679_v50 }
 0x143   : > { %v3888_v40 = vmin.f32 %v1689_v34, %v1690_v36  ;;  %v3890_v41 = vmin.f32 %v1851_v35, %v1852_v37  ;;  %3013 = vmatprep.mubr.msk.bf16.mxu0 %vm774_vm1, %v3289_v13  ;;  %3161 = vmatprep.mubr.msk.bf16.mxu1 %vm774_vm1, %v3695_v53  ;;  %v1854_v44 = vsub.f32 %v3860_v18, %v1269_v39 }
 0x144   : > { %v3893_v42 = vpop.f32.mrf.mxu0  ;;  %v1271_v43 = vpop.f32.mrf.mxu1 }
 0x145   : > { %v1855_v45 = vsub.f32 %v3863_v19, %v1271_v43 }
 0x146   : > { %v3899_v46 = vpop.f32.mrf.mxu0  ;;  %v1273_v47 = vpop.f32.mrf.mxu1 }
 0x147   : > { %v3901_v48 = vmin.f32 %v1854_v44, %v1855_v45  ;;  %v1857_v51 = vsub.f32 %v3860_v18, %v1273_v47 }
 0x148   : > { %v3903_v49 = vpop.f32.mrf.mxu0  ;;  %v1275_v50 = vpop.f32.mrf.mxu1 }
 0x149   : > { %v1858_v52 = vsub.f32 %v3863_v19, %v1275_v50 }
 0x14a   : > { %v1009_v54 = vpop.f32.mrf.mxu0  ;;  %3014 = vmatmul.mubr.msk.bf16.gmra.mxu0 %vm774_vm1, %v3289_v13  ;;  %v1279_v53 = vpop.f32.mrf.mxu1  ;;  %3162 = vmatmul.mubr.msk.bf16.gmra.mxu1 %vm774_vm1, %v3712_v57 }
 0x14b   : > { %v3910_v55 = vmin.f32 %v1857_v51, %v1858_v52  ;;  %v1698_v59 = vsub.f32 %v3860_v18, %v1009_v54  ;;  %v1860_v60 = vsub.f32 %v3860_v18, %v1279_v53 }
 0x14c   : > { %v1011_v56 = vpop.f32.mrf.mxu0  ;;  %v1281_v58 = vpop.f32.mrf.mxu1 }
 0x14d   : > { %v1699_v61 = vsub.f32 %v3863_v19, %v1011_v56  ;;  %v1861_v62 = vsub.f32 %v3863_v19, %v1281_v58 }
 0x14e   : > { %v1013_v63 = vpop.f32.mrf.mxu0  ;;  %v1283_v0 = vpop.f32.mrf.mxu1 }
 0x14f   : > { %v3916_v1 = vmin.f32 %v1698_v59, %v1699_v61  ;;  %v3918_v2 = vmin.f32 %v1860_v60, %v1861_v62  ;;  %v1701_v4 = vsub.f32 %v3860_v18, %v1013_v63  ;;  %v1863_v5 = vsub.f32 %v3860_v18, %v1283_v0 }
 0x150   : > { %v1015_v3 = vpop.f32.mrf.mxu0  ;;  %v1285_v57 = vpop.f32.mrf.mxu1 }
 0x151   : > { %v1702_v6 = vsub.f32 %v3863_v19, %v1015_v3  ;;  %v1864_v7 = vsub.f32 %v3863_v19, %v1285_v57 }
 0x152   : > { %v3924_v8 = vpop.f32.mrf.mxu0  ;;  %v1289_v9 = vpop.f32.mrf.mxu1 }
 0x153   : > { %v3926_v10 = vmin.f32 %v1701_v4, %v1702_v6  ;;  %v3928_v11 = vmin.f32 %v1863_v5, %v1864_v7  ;;  %v1866_v12 = vsub.f32 %v3860_v18, %v1289_v9 }
 0x154   : > { %v3930_v13 = vpop.f32.mrf.mxu0  ;;  %v1291_v14 = vpop.f32.mrf.mxu1 }
 0x155   : > { %v1867_v16 = vsub.f32 %v3863_v19, %v1291_v14 }
 0x156   : > { %v3934_v20 = vpop.f32.mrf.mxu0  ;;  %v1293_v21 = vpop.f32.mrf.mxu1 }
 0x157   : > { %v3936_v22 = vmin.f32 %v1866_v12, %v1867_v16  ;;  %v1869_v25 = vsub.f32 %v3860_v18, %v1293_v21 }
 0x158   : > { %v3938_v23 = vpop.f32.mrf.mxu0  ;;  %v1295_v24 = vpop.f32.mrf.mxu1 }
 0x159   : > { %v1870_v26 = vsub.f32 %v3863_v19, %v1295_v24 }
 0x15a   : > { %v3942_v27 = vpop.f32.mrf.mxu0  ;;  %v1299_v28 = vpop.f32.mrf.mxu1 }
 0x15b   : > { %v3944_v29 = vmin.f32 %v1869_v25, %v1870_v26  ;;  %v1872_v34 = vsub.f32 %v3860_v18, %v1299_v28 }
 0x15c   : > { %v3946_v32 = vpop.f32.mrf.mxu0  ;;  %v1301_v33 = vpop.f32.mrf.mxu1 }
 0x15d   : > { %v1873_v35 = vsub.f32 %v3863_v19, %v1301_v33 }
 0x15e   : > { %v3950_v36 = vpop.f32.mrf.mxu0  ;;  %v1303_v37 = vpop.f32.mrf.mxu1 }
 0x15f   : > { %v3952_v39 = vmin.f32 %v1872_v34, %v1873_v35  ;;  %v1875_v45 = vsub.f32 %v3860_v18, %v1303_v37 }
 0x160   : > { %v3954_v43 = vpop.f32.mrf.mxu0  ;;  %v1305_v44 = vpop.f32.mrf.mxu1 }
 0x161   : > { %v1876_v47 = vsub.f32 %v3863_v19, %v1305_v44 }
 0x162   : > { %v3958_v50 = vpop.f32.mrf.mxu0  ;;  %v1309_v51 = vpop.f32.mrf.mxu1 }
 0x163   : > { %v3960_v52 = vmin.f32 %v1875_v45, %v1876_v47  ;;  %v1878_v56 = vsub.f32 %v3860_v18, %v1309_v51 }
 0x164   : > { %v3962_v54 = vpop.f32.mrf.mxu0  ;;  %v1311_v53 = vpop.f32.mrf.mxu1 }
 0x165   : > { %v1879_v58 = vsub.f32 %v3863_v19, %v1311_v53 }
 0x166   : > { %v3966_v59 = vpop.f32.mrf.mxu0  ;;  %v1313_v60 = vpop.f32.mrf.mxu1 }
 0x167   : > { %v3968_v61 = vmin.f32 %v1878_v56, %v1879_v58  ;;  %v1881_v0 = vsub.f32 %v3860_v18, %v1313_v60 }
 0x168   : > { %v3970_v62 = vpop.f32.mrf.mxu0  ;;  %v1315_v63 = vpop.f32.mrf.mxu1 }
 0x169   : > { %v1882_v3 = vsub.f32 %v3863_v19, %v1315_v63 }
 0x16a   : > { %v3974_v57 = vpop.f32.mrf.mxu0  ;;  %v1319_v4 = vpop.f32.mrf.mxu1 }
 0x16b   : > { %v3976_v5 = vmin.f32 %v1881_v0, %v1882_v3  ;;  %v1884_v9 = vsub.f32 %v3860_v18, %v1319_v4 }
 0x16c   : > { %v3978_v6 = vpop.f32.mrf.mxu0  ;;  %v1321_v7 = vpop.f32.mrf.mxu1 }
 0x16d   : > { %4943 = vst [vmem:[#allocation3_spill] sm:$0xff] %v3976_v5  ;;  %v1885_v14 = vsub.f32 %v3863_v19, %v1321_v7 }
 0x16e   : > { %v3982_v12 = vpop.f32.mrf.mxu0  ;;  %v1323_v16 = vpop.f32.mrf.mxu1 }
 0x16f   : > { %v3984_v21 = vmin.f32 %v1884_v9, %v1885_v14  ;;  %v1887_v26 = vsub.f32 %v3860_v18, %v1323_v16  ;;  %v1681_v9 = vsub.s32 2, %v3842_v15 }
 0x170   : > { %v3986_v24 = vpop.f32.mrf.mxu0  ;;  %v1325_v25 = vpop.f32.mrf.mxu1 }
 0x171   : > { %v1888_v28 = vsub.f32 %v3863_v19, %v1325_v25 }
 0x172   : > { %v3990_v33 = vpop.f32.mrf.mxu0  ;;  %v1329_v34 = vpop.f32.mrf.mxu1 }
 0x173   : > { %v3992_v35 = vmin.f32 %v1887_v26, %v1888_v28  ;;  %v1890_v45 = vsub.f32 %v3860_v18, %v1329_v34 }
 0x174   : > { %v3994_v37 = vpop.f32.mrf.mxu0  ;;  %v1331_v44 = vpop.f32.mrf.mxu1 }
 0x175   : > { %v1891_v47 = vsub.f32 %v3863_v19, %v1331_v44  ;;  %v1693_v44 = vsub.f32 %v3863_v19, %v3893_v42  ;;  %v1696_v42 = vsub.f32 %v3863_v19, %v3903_v49 }
 0x176   : > { %v3998_v51 = vpop.f32.mrf.mxu0  ;;  %v1333_v53 = vpop.f32.mrf.mxu1 }
 0x177   : > { %v4000_v56 = vmin.f32 %v1890_v45, %v1891_v47  ;;  %v1893_v63 = vsub.f32 %v3860_v18, %v1333_v53  ;;  %v4022_v47 = vrot.slane %v3857_v17, %v1681_v9 }
 0x178   : > { %v4002_v58 = vpop.f32.mrf.mxu0  ;;  %v1335_v60 = vpop.f32.mrf.mxu1 }
 0x179   : > { %4944 = vst [vmem:[#allocation4_spill] sm:$0xff] %v4000_v56  ;;  %v1894_v0 = vsub.f32 %v3863_v19, %v1335_v60  ;;  %v1692_v60 = vsub.f32 %v3860_v18, %v3883_v38  ;;  %v1695_v38 = vsub.f32 %v3860_v18, %v3899_v46 }
 0x17a   : > { %v4006_v3 = vpop.f32.mrf.mxu0  ;;  %v1339_v4 = vpop.f32.mrf.mxu1 }
 0x17b   : > { %v4008_v7 = vmin.f32 %v1893_v63, %v1894_v0  ;;  %v1896_v25 = vsub.f32 %v3860_v18, %v1339_v4  ;;  %v1982_v9 = vmin.f32 %v1692_v60, %v1693_v44  ;;  %v1986_v5 = vmin.f32 %v1695_v38, %v1696_v42 }
 0x17c   : > { %v4011_v14 = vpop.f32.mrf.mxu0  ;;  %v1341_v16 = vpop.f32.mrf.mxu1  ;;  %v1705_v60 = vsub.f32 %v3863_v19, %v3930_v13  ;;  %v1704_v42 = vsub.f32 %v3860_v18, %v3924_v8 }
 0x17d   : > { %4945 = vst [vmem:[#allocation5_spill] sm:$0xff] %v4008_v7  ;;  %v1897_v26 = vsub.f32 %v3863_v19, %v1341_v16 }
 0x17e   : > { %v4015_v28 = vpop.f32.mrf.mxu0  ;;  %v1343_v34 = vpop.f32.mrf.mxu1 }
 0x17f   : > { %v4019_v45 = vmin.f32 %v1896_v25, %v1897_v26  ;;  %v1899_v63 = vsub.f32 %v3860_v18, %v1343_v34 }
 0x180   : > { %v4024_v53 = vpop.f32.mrf.mxu0  ;;  %v1345_v15 = vpop.f32.mrf.mxu1 }
 0x181   : > { %4946 = vst [vmem:[#allocation6_spill] sm:$0xff] %v4019_v45  ;;  %v1900_v0 = vsub.f32 %v3863_v19, %v1345_v15 }
 0x182   : > { %v4030_v4 = vpop.f32.mrf.mxu0  ;;  %v3095_v16 = vpop.f32.mrf.mxu1 }
 0x183   : > { %v4034_v25 = vmin.f32 %v1899_v63, %v1900_v0  ;;  %v1694_v17 = vsub.f32 %v4022_v47, %v3095_v16 }
 0x184   : > { %v4037_v26 = vpop.f32.mrf.mxu0  ;;  %v1382_v45 = vpop.f32.mrf.mxu1 }
 0x185   : > { %v1688_v34 = vsub.f32 %v4022_v47, %v1382_v45  ;;  %v1983_v15 = vmin.f32 %v1982_v9, %v1694_v17 }
 0x186   : > { %v4042_v7 = vpop.f32.mrf.mxu0  ;;  %v3096_v56 = vpop.f32.mrf.mxu1 }
 0x187   : > { %v1697_v49 = vsub.f32 %v4022_v47, %v3096_v56  ;;  %1984 = vmin.xlane.f32.xlu1 %v1983_v15  ;;  %v1975_v63 = vmin.f32 %v3877_v31, %v1688_v34  ;;  %v1708_v56 = vsub.f32 %v3863_v19, %v3938_v23  ;;  %v1998_v34 = vmin.f32 %v1704_v42, %v1705_v60 }
 0x188   : > { %v4046_v0 = vpop.f32.mrf.mxu0  ;;  %v1385_v44 = vpop.f32.mrf.mxu1 }
 0x189   : > { %v1691_v46 = vsub.f32 %v4022_v47, %v1385_v44  ;;  %1976 = vmin.xlane.f32.xlu0 %v1975_v63  ;;  %v1987_v45 = vmin.f32 %v1986_v5, %v1697_v49  ;;  %v1707_v5 = vsub.f32 %v3860_v18, %v3934_v20 }
 0x18a   : > { %v4051_v16 = vpop.f32.mrf.mxu0  ;;  %v3099_v17 = vpop.f32.mrf.mxu1 }
 0x18b   : > { %v1706_v31 = vsub.f32 %v4022_v47, %v3099_v17  ;;  %1988 = vmin.xlane.f32.xlu1 %v1987_v45  ;;  %v1979_v9 = vmin.f32 %v3888_v40, %v1691_v46  ;;  %v2002_v8 = vmin.f32 %v1707_v5, %v1708_v56  ;;  %v1717_v46 = vsub.f32 %v3863_v19, %v3962_v54 }
 0x18c   : > { %v4059_v38 = vpop.f32.mrf.mxu0  ;;  %v1398_v13 = vpop.f32.mrf.mxu1  ;;  %v1716_v56 = vsub.f32 %v3860_v18, %v3958_v50  ;;  %v1711_v5 = vsub.f32 %v3863_v19, %v3946_v32 }
 0x18d   : > { %1980 = vmin.xlane.f32.xlu0 %v1979_v9  ;;  %v1700_v63 = vsub.f32 %v4022_v47, %v1398_v13  ;;  %v1999_v44 = vmin.f32 %v1998_v34, %v1706_v31  ;;  %v1720_v9 = vsub.f32 %v3863_v19, %v3970_v62  ;;  %v1710_v62 = vsub.f32 %v3860_v18, %v3942_v27 }
 0x18e   : > { %v4063_v15 = vpop.f32.mrf.mxu0  ;;  %v3100_v49 = vpop.f32.mrf.mxu1 }
 0x18f   : > { %v1709_v23 = vsub.f32 %v4022_v47, %v3100_v49  ;;  %v1991_v13 = vmin.f32 %v3916_v1, %v1700_v63  ;;  %v2014_v49 = vmin.f32 %v1716_v56, %v1717_v46  ;;  %v2006_v27 = vmin.f32 %v1710_v62, %v1711_v5 }
 0x190   : > { %v4067_v45 = vpop.f32.mrf.mxu0  ;;  %v1401_v40 = vpop.f32.mrf.mxu1  ;;  %v1731_v62 = vsub.f32 %v3860_v18, %v3998_v51  ;;  %v1725_v51 = vsub.f32 %v3860_v18, %v3982_v12  ;;  %v1744_v12 = vsub.f32 %v3863_v19, %v4046_v0  ;;  %v1738_v0 = vsub.f32 %v3863_v19, %v4024_v53 }
 0x191   : > { %v1703_v60 = vsub.f32 %v4022_v47, %v1401_v40  ;;  %2000 = vmin.xlane.f32.xlu0 %v1999_v44  ;;  %v2003_v20 = vmin.f32 %v2002_v8, %v1709_v23  ;;  %v1719_v8 = vsub.f32 %v3860_v18, %v3966_v59  ;;  %v1714_v23 = vsub.f32 %v3863_v19, %v3954_v43 }
 0x192   : > { %v4072_v17 = vpop.f32.mrf.mxu0  ;;  %v3103_v42 = vpop.f32.mrf.mxu1  ;;  %v1713_v59 = vsub.f32 %v3860_v18, %v3950_v36  ;;  %v1729_v43 = vsub.f32 %v3863_v19, %v3994_v37  ;;  %v1732_v36 = vsub.f32 %v3863_v19, %v4002_v58  ;;  %v1726_v58 = vsub.f32 %v3863_v19, %v3986_v24 }
 0x193   : > { %v1718_v31 = vsub.f32 %v4022_v47, %v3103_v42  ;;  %2004 = vmin.xlane.f32.xlu1 %v2003_v20  ;;  %v1995_v50 = vmin.f32 %v3926_v10, %v1703_v60  ;;  %v2018_v44 = vmin.f32 %v1719_v8, %v1720_v9  ;;  %v1723_v8 = vsub.f32 %v3863_v19, %v3978_v6 }
 0x194   : > { %v4080_v34 = vpop.f32.mrf.mxu0  ;;  %v1414_v54 = vpop.f32.mrf.mxu1  ;;  %v2010_v56 = vmin.f32 %v1713_v59, %v1714_v23  ;;  %v1741_v24 = vsub.f32 %v3863_v19, %v4037_v26 }
 0x195   : > { %1992 = vmin.xlane.f32.xlu0 %v1991_v13  ;;  %v1712_v40 = vsub.f32 %v4022_v47, %v1414_v54  ;;  %v2015_v46 = vmin.f32 %v2014_v49, %v1718_v31  ;;  %v1728_v31 = vsub.f32 %v3860_v18, %v3990_v33  ;;  %v1722_v33 = vsub.f32 %v3860_v18, %v3974_v57 }
 0x196   : > { %v4091_v1 = vpop.f32.mrf.mxu0  ;;  %v3104_v63 = vpop.f32.mrf.mxu1 }
 0x197   : > { %v1721_v32 = vsub.f32 %v4022_v47, %v3104_v63  ;;  %1996 = vmin.xlane.f32.xlu1 %v1995_v50  ;;  %v2007_v5 = vmin.f32 %v2006_v27, %v1712_v40  ;;  %v2030_v50 = vmin.f32 %v1728_v31, %v1729_v43  ;;  %v2034_v40 = vmin.f32 %v1731_v62, %v1732_v36 }
 0x198   : > { %v4097_v10 = vpop.f32.mrf.mxu0  ;;  %v1417_v60 = vpop.f32.mrf.mxu1  ;;  %v2022_v57 = vmin.f32 %v1722_v33, %v1723_v8  ;;  %v1743_v8 = vsub.f32 %v3860_v18, %v4042_v7  ;;  %v1737_v7 = vsub.f32 %v3860_v18, %v4015_v28 }
 0x199   : > { %v1715_v20 = vsub.f32 %v4022_v47, %v1417_v60  ;;  %2016 = vmin.xlane.f32.xlu0 %v2015_v46  ;;  %v2019_v42 = vmin.f32 %v2018_v44, %v1721_v32  ;;  %v1756_v28 = vsub.f32 %v3863_v19, %v4097_v10  ;;  %v1750_v10 = vsub.f32 %v3863_v19, %v4067_v45 }
 0x19a   : > { %v4102_v9 = vpop.f32.mrf.mxu0  ;;  %v3107_v13 = vpop.f32.mrf.mxu1  ;;  %v2050_v33 = vmin.f32 %v1743_v8, %v1744_v12  ;;  %v1755_v12 = vsub.f32 %v3860_v18, %v4091_v1  ;;  %v1749_v1 = vsub.f32 %v3860_v18, %v4063_v15 }
 0x19b   : > { %v1730_v54 = vsub.f32 %v4022_v47, %v3107_v13  ;;  %2020 = vmin.xlane.f32.xlu1 %v2019_v42  ;;  %v2011_v23 = vmin.f32 %v2010_v56, %v1715_v20  ;;  %v2026_v20 = vmin.f32 %v1725_v51, %v1726_v58  ;;  %v1740_v13 = vsub.f32 %v3860_v18, %v4030_v4 }
 0x19c   : > { %v4109_v49 = vpop.f32.mrf.mxu0  ;;  %v1430_v37 = vpop.f32.mrf.mxu1  ;;  %v1734_v4 = vsub.f32 %v3860_v18, %v4006_v3  ;;  %v1753_v3 = vsub.f32 %v3863_v19, %v4080_v34  ;;  %v2042_v51 = vmin.f32 %v1737_v7, %v1738_v0 }
 0x19d   : > { %2008 = vmin.xlane.f32.xlu0 %v2007_v5  ;;  %v1724_v32 = vsub.f32 %v4022_v47, %v1430_v37  ;;  %v2031_v46 = vmin.f32 %v2030_v50, %v1730_v54  ;;  %v1735_v5 = vsub.f32 %v3863_v19, %v4011_v14  ;;  %v2046_v37 = vmin.f32 %v1740_v13, %v1741_v24 }
 0x19e   : > { %v4119_v63 = vpop.f32.mrf.mxu0  ;;  %v3108_v44 = vpop.f32.mrf.mxu1  ;;  %v1752_v24 = vsub.f32 %v3860_v18, %v4072_v17  ;;  %v1746_v17 = vsub.f32 %v3860_v18, %v4051_v16 }
 0x19f   : > { %v1733_v6 = vsub.f32 %v4022_v47, %v3108_v44  ;;  %2012 = vmin.xlane.f32.xlu1 %v2011_v23  ;;  %v2023_v36 = vmin.f32 %v2022_v57, %v1724_v32 }
 0x1a0   : > { %v4125_v59 = vpop.f32.mrf.mxu0  ;;  %v1433_v60 = vpop.f32.mrf.mxu1  ;;  %v2062_v13 = vmin.f32 %v1752_v24, %v1753_v3 }
 0x1a1   : > { %v1727_v27 = vsub.f32 %v4022_v47, %v1433_v60  ;;  %2032 = vmin.xlane.f32.xlu0 %v2031_v46  ;;  %v2035_v43 = vmin.f32 %v2034_v40, %v1733_v6  ;;  %v2038_v6 = vmin.f32 %v1734_v4, %v1735_v5  ;;  %v2066_v5 = vmin.f32 %v1755_v12, %v1756_v28 }
 0x1a2   : > { %v4130_v42 = vpop.f32.mrf.mxu0  ;;  %v3111_v56 = vpop.f32.mrf.mxu1 }
 0x1a3   : > { %v1742_v31 = vsub.f32 %v4022_v47, %v3111_v56  ;;  %2036 = vmin.xlane.f32.xlu1 %v2035_v43  ;;  %v2027_v50 = vmin.f32 %v2026_v20, %v1727_v27  ;;  %v1747_v56 = vsub.f32 %v3863_v19, %v4059_v38 }
 0x1a4   : > { %v4137_v54 = vpop.f32.mrf.mxu0  ;;  %v1446_v26 = vpop.f32.mrf.mxu1 }
 0x1a5   : > { %2024 = vmin.xlane.f32.xlu0 %v2023_v36  ;;  %v1736_v58 = vsub.f32 %v4022_v47, %v1446_v26  ;;  %v2047_v44 = vmin.f32 %v2046_v37, %v1742_v31  ;;  %v2054_v16 = vmin.f32 %v1746_v17, %v1747_v56  ;;  %v1765_v45 = vsub.f32 %v3863_v19, %v4137_v54 }
 0x1a6   : > { %v4147_v62 = vpop.f32.mrf.mxu0  ;;  %v3112_v23 = vpop.f32.mrf.mxu1  ;;  %v1759_v54 = vsub.f32 %v3863_v19, %v4109_v49 }
 0x1a7   : > { %v1745_v14 = vsub.f32 %v4022_v47, %v3112_v23  ;;  %2028 = vmin.xlane.f32.xlu1 %v2027_v50  ;;  %v2039_v43 = vmin.f32 %v2038_v6, %v1736_v58 }
 0x1a8   : > { %v1125_v40 = vpop.f32.mrf.mxu0  ;;  %v1449_v32 = vpop.f32.mrf.mxu1 }
 0x1a9   : > { %v1739_v53 = vsub.f32 %v4022_v47, %v1449_v32  ;;  %2048 = vmin.xlane.f32.xlu0 %v2047_v44  ;;  %v2051_v46 = vmin.f32 %v2050_v33, %v1745_v14  ;;  %v2058_v33 = vmin.f32 %v1749_v1, %v1750_v10  ;;  %v1764_v44 = vsub.f32 %v3860_v18, %v4130_v42 }
 0x1aa   : > { %v4156_v60 = vpop.f32.mrf.mxu0  ;;  %v3115_v57 = vpop.f32.mrf.mxu1  ;;  %v1768_v7 = vsub.f32 %v3863_v19, %v1125_v40  ;;  %v1758_v42 = vsub.f32 %v3860_v18, %v4102_v9  ;;  %v1762_v40 = vsub.f32 %v3863_v19, %v4125_v59 }
 0x1ab   : > { %v1754_v27 = vsub.f32 %v4022_v47, %v3115_v57  ;;  %2052 = vmin.xlane.f32.xlu1 %v2051_v46  ;;  %v2043_v31 = vmin.f32 %v2042_v51, %v1739_v53  ;;  %v2078_v53 = vmin.f32 %v1764_v44, %v1765_v45  ;;  %v1767_v46 = vsub.f32 %v3860_v18, %v4147_v62 }
 0x1ac   : > { %v4163_v20 = vpop.f32.mrf.mxu0  ;;  %v1462_v34 = vpop.f32.mrf.mxu1  ;;  %v1761_v62 = vsub.f32 %v3860_v18, %v4119_v63 }
 0x1ad   : > { %2040 = vmin.xlane.f32.xlu0 %v2039_v43  ;;  %v1748_v37 = vsub.f32 %v4022_v47, %v1462_v34  ;;  %v2063_v8 = vmin.f32 %v2062_v13, %v1754_v27  ;;  %v2082_v28 = vmin.f32 %v1767_v46, %v1768_v7  ;;  %v2070_v13 = vmin.f32 %v1758_v42, %v1759_v54 }
 0x1ae   : > { %v4173_v36 = vpop.f32.mrf.mxu0  ;;  %v3116_v26 = vpop.f32.mrf.mxu1  ;;  %v1771_v1 = vsub.f32 %v3863_v19, %v4163_v20 }
 0x1af   : > { %v1757_v38 = vsub.f32 %v4022_v47, %v3116_v26  ;;  %2044 = vmin.xlane.f32.xlu1 %v2043_v31  ;;  %v2055_v32 = vmin.f32 %v2054_v16, %v1748_v37  ;;  %v2074_v31 = vmin.f32 %v1761_v62, %v1762_v40 }
 0x1b0   : > { %v4179_v50 = vpop.f32.mrf.mxu0  ;;  %v1465_v4 = vpop.f32.mrf.mxu1 }
 0x1b1   : > { %v1751_v0 = vsub.f32 %v4022_v47, %v1465_v4  ;;  %2064 = vmin.xlane.f32.xlu0 %v2063_v8  ;;  %v2067_v23 = vmin.f32 %v2066_v5, %v1757_v38 }
 0x1b2   : > { %v1139_v58 = vpop.f32.mrf.mxu0  ;;  %v3119_v14 = vpop.f32.mrf.mxu1 }
 0x1b3   : > { %v1766_v15 = vsub.f32 %v4022_v47, %v3119_v14  ;;  %2068 = vmin.xlane.f32.xlu1 %v2067_v23  ;;  %v2059_v51 = vmin.f32 %v2058_v33, %v1751_v0  ;;  %v1776_v26 = vsub.f32 %v3860_v18, %v1139_v58  ;;  %v1770_v0 = vsub.f32 %v3860_v18, %v4156_v60 }
 0x1b4   : > { %v1141_v6 = vpop.f32.mrf.mxu0  ;;  %v1478_v3 = vpop.f32.mrf.mxu1  ;;  %v1774_v23 = vsub.f32 %v3863_v19, %v4179_v50  ;;  %v1773_v60 = vsub.f32 %v3860_v18, %v4173_v36 }
 0x1b5   : > { %2056 = vmin.xlane.f32.xlu0 %v2055_v32  ;;  %v1760_v27 = vsub.f32 %v4022_v47, %v1478_v3  ;;  %v2079_v49 = vmin.f32 %v2078_v53, %v1766_v15  ;;  %v1777_v9 = vsub.f32 %v3863_v19, %v1141_v6  ;;  %v2086_v3 = vmin.f32 %v1770_v0, %v1771_v1 }
 0x1b6   : > { %v1143_v57 = vpop.f32.mrf.mxu0  ;;  %v3120_v24 = vpop.f32.mrf.mxu1  ;;  %v2090_v42 = vmin.f32 %v1773_v60, %v1774_v23 }
 0x1b7   : > { %v1769_v43 = vsub.f32 %v4022_v47, %v3120_v24  ;;  %2060 = vmin.xlane.f32.xlu1 %v2059_v51  ;;  %v2071_v63 = vmin.f32 %v2070_v13, %v1760_v27  ;;  %v2094_v4 = vmin.f32 %v1776_v26, %v1777_v9  ;;  %v1779_v16 = vsub.f32 %v3860_v18, %v1143_v57 }
 0x1b8   : > { %v1145_v34 = vpop.f32.mrf.mxu0  ;;  %v1481_v56 = vpop.f32.mrf.mxu1 }
 0x1b9   : > { %v1763_v12 = vsub.f32 %v4022_v47, %v1481_v56  ;;  %2080 = vmin.xlane.f32.xlu0 %v2079_v49  ;;  %v2083_v59 = vmin.f32 %v2082_v28, %v1769_v43  ;;  %v1780_v5 = vsub.f32 %v3863_v19, %v1145_v34 }
 0x1ba   : > { %v1149_v17 = vpop.f32.mrf.mxu0  ;;  %v3123_v10 = vpop.f32.mrf.mxu1 }
 0x1bb   : > { %v1778_v37 = vsub.f32 %v4022_v47, %v3123_v10  ;;  %2084 = vmin.xlane.f32.xlu1 %v2083_v59  ;;  %v2075_v45 = vmin.f32 %v2074_v31, %v1763_v12  ;;  %v2098_v14 = vmin.f32 %v1779_v16, %v1780_v5  ;;  %v1782_v53 = vsub.f32 %v3860_v18, %v1149_v17 }
 0x1bc   : > { %v1151_v38 = vpop.f32.mrf.mxu0  ;;  %v1494_v8 = vpop.f32.mrf.mxu1 }
 0x1bd   : > { %2072 = vmin.xlane.f32.xlu0 %v2071_v63  ;;  %v1772_v44 = vsub.f32 %v4022_v47, %v1494_v8  ;;  %v2095_v20 = vmin.f32 %v2094_v4, %v1778_v37  ;;  %v1783_v15 = vsub.f32 %v3863_v19, %v1151_v38 }
 0x1be   : > { %v1153_v33 = vpop.f32.mrf.mxu0  ;;  %v3124_v58 = vpop.f32.mrf.mxu1 }
 0x1bf   : > { %v1781_v7 = vsub.f32 %v4022_v47, %v3124_v58  ;;  %2076 = vmin.xlane.f32.xlu1 %v2075_v45  ;;  %v2087_v40 = vmin.f32 %v2086_v3, %v1772_v44  ;;  %v2102_v57 = vmin.f32 %v1782_v53, %v1783_v15  ;;  %v1785_v34 = vsub.f32 %v3860_v18, %v1153_v33 }
 0x1c0   : > { %v1155_v32 = vpop.f32.mrf.mxu0  ;;  %v1497_v6 = vpop.f32.mrf.mxu1 }
 0x1c1   : > { %v1775_v54 = vsub.f32 %v4022_v47, %v1497_v6  ;;  %2096 = vmin.xlane.f32.xlu0 %v2095_v20  ;;  %v2099_v50 = vmin.f32 %v2098_v14, %v1781_v7  ;;  %v1786_v24 = vsub.f32 %v3863_v19, %v1155_v32 }
 0x1c2   : > { %v1159_v46 = vpop.f32.mrf.mxu0  ;;  %v3127_v51 = vpop.f32.mrf.mxu1 }
 0x1c3   : > { %2100 = vmin.xlane.f32.xlu1 %v2099_v50  ;;  %v1788_v43 = vsub.f32 %v3860_v18, %v1159_v46  ;;  %v2091_v62 = vmin.f32 %v2090_v42, %v1775_v54  ;;  %v2106_v59 = vmin.f32 %v1785_v34, %v1786_v24  ;;  %v1790_v10 = vsub.f32 %v4022_v47, %v3127_v51 }
 0x1c4   : > { %v1161_v28 = vpop.f32.mrf.mxu0  ;;  %v1510_v27 = vpop.f32.mrf.mxu1 }
 0x1c5   : > { %v1789_v36 = vsub.f32 %v3863_v19, %v1161_v28  ;;  %v1784_v49 = vsub.f32 %v4022_v47, %v1510_v27  ;;  %2088 = vmin.xlane.f32.xlu0 %v2087_v40 }
 0x1c6   : > { %v1163_v56 = vpop.f32.mrf.mxu0  ;;  %v3128_v13 = vpop.f32.mrf.mxu1 }
 0x1c7   : > { %v2110_v9 = vmin.f32 %v1788_v43, %v1789_v36  ;;  %2092 = vmin.xlane.f32.xlu1 %v2091_v62  ;;  %v2103_v12 = vmin.f32 %v2102_v57, %v1784_v49  ;;  %v1791_v26 = vsub.f32 %v3860_v18, %v1163_v56  ;;  %v1793_v0 = vsub.f32 %v4022_v47, %v3128_v13 }
 0x1c8   : > { %v1165_v31 = vpop.f32.mrf.mxu0  ;;  %v1513_v17 = vpop.f32.mrf.mxu1 }
 0x1c9   : > { %v1792_v5 = vsub.f32 %v3863_v19, %v1165_v31  ;;  %v1787_v37 = vsub.f32 %v4022_v47, %v1513_v17  ;;  %2104 = vmin.xlane.f32.xlu0 %v2103_v12  ;;  %v2111_v4 = vmin.f32 %v2110_v9, %v1790_v10 }
 0x1ca   : > { %v1169_v63 = vpop.f32.mrf.mxu0  ;;  %v3131_v38 = vpop.f32.mrf.mxu1 }
 0x1cb   : > { %v2114_v8 = vmin.f32 %v1791_v26, %v1792_v5  ;;  %v2107_v1 = vmin.f32 %v2106_v59, %v1787_v37  ;;  %v1794_v23 = vsub.f32 %v3860_v18, %v1169_v63  ;;  %v1802_v43 = vsub.f32 %v4022_v47, %v3131_v38 }
 0x1cc   : > { %v1171_v16 = vpop.f32.mrf.mxu0  ;;  %v1526_v45 = vpop.f32.mrf.mxu1 }
 0x1cd   : > { %v1795_v33 = vsub.f32 %v3863_v19, %v1171_v16  ;;  %2108 = vmin.xlane.f32.xlu1 %v2107_v1  ;;  %2112 = vmin.xlane.f32.xlu0 %v2111_v4  ;;  %v1796_v7 = vsub.f32 %v4022_v47, %v1526_v45  ;;  %v2115_v20 = vmin.f32 %v2114_v8, %v1793_v0 }
 0x1ce   : > { %v1173_v58 = vpop.f32.mrf.mxu0  ;;  %v3132_v14 = vpop.f32.mrf.mxu1 }
 0x1cf   : > { %v2118_v44 = vmin.f32 %v1794_v23, %v1795_v33  ;;  %v1797_v6 = vsub.f32 %v3860_v18, %v1173_v58  ;;  %v1805_v59 = vsub.f32 %v4022_v47, %v3132_v14 }
 0x1d0   : > { %v1175_v15 = vpop.f32.mrf.mxu0  ;;  %v1529_v32 = vpop.f32.mrf.mxu1 }
 0x1d1   : > { %v1798_v3 = vsub.f32 %v3863_v19, %v1175_v15  ;;  %2116 = vmin.xlane.f32.xlu1 %v2115_v20  ;;  %v2119_v60 = vmin.f32 %v2118_v44, %v1796_v7  ;;  %v1799_v46 = vsub.f32 %v4022_v47, %v1529_v32 }
 0x1d2   : > { %v1179_v54 = vpop.f32.mrf.mxu0  ;;  %v3135_v50 = vpop.f32.mrf.mxu1 }
 0x1d3   : > { %v2122_v53 = vmin.f32 %v1797_v6, %v1798_v3  ;;  %2120 = vmin.xlane.f32.xlu0 %v2119_v60  ;;  %v1800_v40 = vsub.f32 %v3860_v18, %v1179_v54  ;;  %v1814_v54 = vsub.f32 %v4022_v47, %v3135_v50 }
 0x1d4   : > { %v1181_v51 = vpop.f32.mrf.mxu0  ;;  %v1542_v42 = vpop.f32.mrf.mxu1 }
 0x1d5   : > { %v1801_v57 = vsub.f32 %v3863_v19, %v1181_v51  ;;  %v2123_v24 = vmin.f32 %v2122_v53, %v1799_v46  ;;  %v1808_v8 = vsub.f32 %v4022_v47, %v1542_v42 }
 0x1d6   : > { %v1183_v28 = vpop.f32.mrf.mxu0  ;;  %v3136_v27 = vpop.f32.mrf.mxu1 }
 0x1d7   : > { %v2126_v36 = vmin.f32 %v1800_v40, %v1801_v57  ;;  %2124 = vmin.xlane.f32.xlu1 %v2123_v24  ;;  %v1803_v34 = vsub.f32 %v3860_v18, %v1183_v28 }
 0x1d8   : > { %v1185_v49 = vpop.f32.mrf.mxu0  ;;  %v1545_v62 = vpop.f32.mrf.mxu1 }
 0x1d9   : > { %v1804_v56 = vsub.f32 %v3863_v19, %v1185_v49  ;;  %v2127_v13 = vmin.f32 %v2126_v36, %v1802_v43  ;;  %v1811_v14 = vsub.f32 %v4022_v47, %v1545_v62  ;;  %v1817_v43 = vsub.f32 %v4022_v47, %v3136_v27 }
 0x1da   : > { %v1189_v9 = vpop.f32.mrf.mxu0  ;;  %v4240_v12 = vpop.f32.mrf.mxu1 }
 0x1db   : > { %v2130_v31 = vmin.f32 %v1803_v34, %v1804_v56  ;;  %2128 = vmin.xlane.f32.xlu0 %v2127_v13  ;;  %v1806_v26 = vsub.f32 %v3860_v18, %v1189_v9 }
 0x1dc   : > { %v1191_v17 = vpop.f32.mrf.mxu0  ;;  %v1558_v10 = vpop.f32.mrf.mxu1 }
 0x1dd   : > { %v1807_v5 = vsub.f32 %v3863_v19, %v1191_v17  ;;  %v2131_v37 = vmin.f32 %v2130_v31, %v1805_v59  ;;  %v1820_v17 = vsub.f32 %v4022_v47, %v1558_v10 }
 0x1de   : > { %v1193_v63 = vpop.f32.mrf.mxu0  ;;  %v4245_v38 = vpop.f32.mrf.mxu1 }
 0x1df   : > { %v2134_v1 = vmin.f32 %v1806_v26, %v1807_v5  ;;  %2132 = vmin.xlane.f32.xlu1 %v2131_v37  ;;  %v1809_v45 = vsub.f32 %v3860_v18, %v1193_v63 }
 0x1e0   : > { %v1195_v4 = vpop.f32.mrf.mxu0  ;;  %v4248_v16 = vpop.f32.mrf.mxu1 }
 0x1e1   : > { %v1810_v0 = vsub.f32 %v3863_v19, %v1195_v4  ;;  %v2135_v23 = vmin.f32 %v2134_v1, %v1808_v8  ;;  %v1823_v10 = vsub.f32 %v4022_v47, %v4248_v16 }
 0x1e2   : > { %v1199_v33 = vpop.f32.mrf.mxu0  ;;  %v4252_v58 = vpop.f32.mrf.mxu1 }
 0x1e3   : > { %v2138_v44 = vmin.f32 %v1809_v45, %v1810_v0  ;;  %2136 = vmin.xlane.f32.xlu0 %v2135_v23  ;;  %v1812_v15 = vsub.f32 %v3860_v18, %v1199_v33 }
 0x1e4   : > { %v1201_v7 = vpop.f32.mrf.mxu0  ;;  %v4255_v20 = vpop.f32.mrf.mxu1 }
 0x1e5   : > { %v1813_v32 = vsub.f32 %v3863_v19, %v1201_v7  ;;  %v2139_v6 = vmin.f32 %v2138_v44, %v1811_v14 }
 0x1e6   : > { %v1203_v3 = vpop.f32.mrf.mxu0  ;;  %v4259_v60 = vpop.f32.mrf.mxu1 }
 0x1e7   : > { %v2142_v53 = vmin.f32 %v1812_v15, %v1813_v32  ;;  %2140 = vmin.xlane.f32.xlu1 %v2139_v6  ;;  %v1815_v42 = vsub.f32 %v3860_v18, %v1203_v3 }
 0x1e8   : > { %v1205_v46 = vpop.f32.mrf.mxu0  ;;  %v4262_v51 = vpop.f32.mrf.mxu1 }
 0x1e9   : > { %v1816_v40 = vsub.f32 %v3863_v19, %v1205_v46  ;;  %v2143_v57 = vmin.f32 %v2142_v53, %v1814_v54 }
 0x1ea   : > { %v1209_v24 = vpop.f32.mrf.mxu0  ;;  %v3147_v28 = vpop.f32.mrf.mxu1 }
 0x1eb   : > { %v2146_v36 = vmin.f32 %v1815_v42, %v1816_v40  ;;  %v1850_v49 = vsub.f32 %v4022_v47, %v3147_v28  ;;  %2144 = vmin.xlane.f32.xlu0 %v2143_v57  ;;  %v1818_v34 = vsub.f32 %v3860_v18, %v1209_v24 }
 0x1ec   : > { %v1211_v62 = vpop.f32.mrf.mxu0  ;;  %v4268_v50 = vpop.f32.mrf.mxu1 }
 0x1ed   : > { %v1819_v56 = vsub.f32 %v3863_v19, %v1211_v62  ;;  %v2191_v13 = vmin.f32 %v3875_v30, %v1850_v49  ;;  %v2147_v9 = vmin.f32 %v2146_v36, %v1817_v43  ;;  %v1826_v43 = vsub.f32 %v4022_v47, %v4240_v12 }
 0x1ee   : > { %v1213_v59 = vpop.f32.mrf.mxu0  ;;  %v3148_v31 = vpop.f32.mrf.mxu1 }
 0x1ef   : > { %v2150_v26 = vmin.f32 %v1818_v34, %v1819_v56  ;;  %v1853_v27 = vsub.f32 %v4022_v47, %v3148_v31  ;;  %2192 = vmin.xlane.f32.xlu0 %v2191_v13  ;;  %2148 = vmin.xlane.f32.xlu1 %v2147_v9  ;;  %v1821_v63 = vsub.f32 %v3860_v18, %v1213_v59 }
 0x1f0   : > { %v1215_v5 = vpop.f32.mrf.mxu0  ;;  %v4275_v37 = vpop.f32.mrf.mxu1 }
 0x1f1   : > { %v1822_v8 = vsub.f32 %v3863_v19, %v1215_v5  ;;  %v2195_v1 = vmin.f32 %v3890_v41, %v1853_v27  ;;  %v2151_v30 = vmin.f32 %v2150_v26, %v1820_v17 }
 0x1f2   : > { %v1219_v4 = vpop.f32.mrf.mxu0  ;;  %v3151_v45 = vpop.f32.mrf.mxu1 }
 0x1f3   : > { %v2154_v0 = vmin.f32 %v1821_v63, %v1822_v8  ;;  %v1862_v23 = vsub.f32 %v4022_v47, %v3151_v45  ;;  %2196 = vmin.xlane.f32.xlu1 %v2195_v1  ;;  %2152 = vmin.xlane.f32.xlu0 %v2151_v30  ;;  %v1824_v33 = vsub.f32 %v3860_v18, %v1219_v4 }
 0x1f4   : > { %v1221_v14 = vpop.f32.mrf.mxu0  ;;  %v1606_v44 = vpop.f32.mrf.mxu1 }
 0x1f5   : > { %v1825_v7 = vsub.f32 %v3863_v19, %v1221_v14  ;;  %v1856_v15 = vsub.f32 %v4022_v47, %v1606_v44  ;;  %v2207_v41 = vmin.f32 %v3918_v2, %v1862_v23  ;;  %v2155_v32 = vmin.f32 %v2154_v0, %v1823_v10 }
 0x1f6   : > { %v1223_v6 = vpop.f32.mrf.mxu0  ;;  %v3152_v3 = vpop.f32.mrf.mxu1  ;;  %v1832_v44 = vsub.f32 %v4022_v47, %v4255_v20 }
 0x1f7   : > { %v1865_v16 = vsub.f32 %v4022_v47, %v3152_v3  ;;  %2208 = vmin.xlane.f32.xlu0 %v2207_v41  ;;  %2156 = vmin.xlane.f32.xlu1 %v2155_v32  ;;  %v2158_v54 = vmin.f32 %v1824_v33, %v1825_v7  ;;  %v2199_v57 = vmin.f32 %v3901_v48, %v1856_v15 }
 0x1f8   : > { %v1225_v53 = vpop.f32.mrf.mxu0  ;;  %v1609_v46 = vpop.f32.mrf.mxu1  ;;  %v1827_v36 = vsub.f32 %v3860_v18, %v1223_v6 }
 0x1f9   : > { %v1828_v42 = vsub.f32 %v3863_v19, %v1225_v53  ;;  %v1859_v40 = vsub.f32 %v4022_v47, %v1609_v46  ;;  %v2211_v24 = vmin.f32 %v3928_v11, %v1865_v16  ;;  %v2159_v9 = vmin.f32 %v2158_v54, %v1826_v43 }
 0x1fa   : > { %v1229_v28 = vpop.f32.mrf.mxu0  ;;  %v3155_v2 = vpop.f32.mrf.mxu1  ;;  %v1829_v11 = vsub.f32 %v4022_v47, %v4245_v38 }
 0x1fb   : > { %2200 = vmin.xlane.f32.xlu0 %v2199_v57  ;;  %2212 = vmin.xlane.f32.xlu1 %v2211_v24  ;;  %v2162_v34 = vmin.f32 %v1827_v36, %v1828_v42  ;;  %v1874_v56 = vsub.f32 %v4022_v47, %v3155_v2  ;;  %v2203_v13 = vmin.f32 %v3910_v55, %v1859_v40  ;;  %v1904_v24 = vld [vmem:[#allocation2 + $0x10] sm:$0xff]  ;;  %v1902_v36 = vld [vmem:[#allocation2] sm:$0xff] }
 0x1fc   : > { %v1231_v49 = vpop.f32.mrf.mxu0  ;;  %v1622_v62 = vpop.f32.mrf.mxu1  ;;  %v1830_v12 = vsub.f32 %v3860_v18, %v1229_v28 }
 0x1fd   : > { %v1831_v31 = vsub.f32 %v3863_v19, %v1231_v49  ;;  %v1868_v27 = vsub.f32 %v4022_v47, %v1622_v62  ;;  %v2223_v55 = vmin.f32 %v3952_v39, %v1874_v56  ;;  %v2163_v63 = vmin.f32 %v2162_v34, %v1829_v11 }
 0x1fe   : > { %v1233_v48 = vpop.f32.mrf.mxu0  ;;  %v3156_v59 = vpop.f32.mrf.mxu1 }
 0x1ff   : > { %2204 = vmin.xlane.f32.xlu1 %v2203_v13  ;;  %2160 = vmin.xlane.f32.xlu0 %v2159_v9  ;;  %v1877_v5 = vsub.f32 %v4022_v47, %v3156_v59  ;;  %v2166_v38 = vmin.f32 %v1830_v12, %v1831_v31  ;;  %v1833_v30 = vsub.f32 %v3860_v18, %v1233_v48  ;;  %v1905_v48 = vld [vmem:[#allocation2 + $0x18] sm:$0xff] }
 0x200   : > { %v1235_v17 = vpop.f32.mrf.mxu0  ;;  %v1625_v26 = vpop.f32.mrf.mxu1  ;;  %v2215_v23 = vmin.f32 %v3936_v22, %v1868_v27  ;;  %v1835_v22 = vsub.f32 %v4022_v47, %v4262_v51  ;;  %v1838_v59 = vsub.f32 %v4022_v47, %v4252_v58 }
 0x201   : > { %v1834_v10 = vsub.f32 %v3863_v19, %v1235_v17  ;;  %v1871_v0 = vsub.f32 %v4022_v47, %v1625_v26  ;;  %v2227_v33 = vmin.f32 %v3960_v52, %v1877_v5  ;;  %v2167_v3 = vmin.f32 %v2166_v38, %v1832_v44  ;;  %v1909_v44 = vld [vmem:[#allocation2 + $0x38] sm:$0xff] }
 0x202   : > { %v1239_v8 = vpop.f32.mrf.mxu0  ;;  %v3159_v1 = vpop.f32.mrf.mxu1 }
 0x203   : > { %2224 = vmin.xlane.f32.xlu0 %v2223_v55  ;;  %2164 = vmin.xlane.f32.xlu1 %v2163_v63  ;;  %v2170_v41 = vmin.f32 %v1833_v30, %v1834_v10  ;;  %v1886_v32 = vsub.f32 %v4022_v47, %v3159_v1  ;;  %v2219_v6 = vmin.f32 %v3944_v29, %v1871_v0  ;;  %v4947_v55 = vld [vmem:[#allocation3_spill] sm:$0xff] }
 0x204   : > { %v1241_v4 = vpop.f32.mrf.mxu0  ;;  %v1638_v45 = vpop.f32.mrf.mxu1  ;;  %v1836_v52 = vsub.f32 %v3860_v18, %v1239_v8  ;;  %v1841_v8 = vsub.f32 %v4022_v47, %v4259_v60 }
 0x205   : > { %v1837_v20 = vsub.f32 %v3863_v19, %v1241_v4  ;;  %v1880_v53 = vsub.f32 %v4022_v47, %v1638_v45  ;;  %v2239_v29 = vmin.f32 %v3984_v21, %v1886_v32  ;;  %v2171_v40 = vmin.f32 %v2170_v41, %v1835_v22  ;;  %v1908_v45 = vld [vmem:[#allocation2 + $0x30] sm:$0xff]  ;;  %v1906_v32 = vld [vmem:[#allocation2 + $0x20] sm:$0xff] }
 0x206   : > { %v1243_v14 = vpop.f32.mrf.mxu0  ;;  %v3160_v39 = vpop.f32.mrf.mxu1 }
 0x207   : > { %2216 = vmin.xlane.f32.xlu0 %v2215_v23  ;;  %2228 = vmin.xlane.f32.xlu1 %v2227_v33  ;;  %v1889_v46 = vsub.f32 %v4022_v47, %v3160_v39  ;;  %v2174_v28 = vmin.f32 %v1836_v52, %v1837_v20  ;;  %v1839_v51 = vsub.f32 %v3860_v18, %v1243_v14  ;;  %v4948_v14 = vld [vmem:[#allocation4_spill] sm:$0xff] }
 0x208   : > { %v1245_v7 = vpop.f32.mrf.mxu0  ;;  %v1641_v15 = vpop.f32.mrf.mxu1  ;;  %v2231_v21 = vmin.f32 %v3968_v61, %v1880_v53  ;;  %v1903_v61 = vld [vmem:[#allocation2 + $0x8] sm:$0xff] }
 0x209   : > { %v1840_v2 = vsub.f32 %v3863_v19, %v1245_v7  ;;  %v1883_v49 = vsub.f32 %v4022_v47, %v1641_v15  ;;  %v2243_v56 = vmin.f32 %v3992_v35, %v1889_v46  ;;  %v2175_v63 = vmin.f32 %v2174_v28, %v1838_v59  ;;  %v1907_v20 = vld [vmem:[#allocation2 + $0x28] sm:$0xff]  ;;  %v1912_v46 = vld [vmem:[#allocation2 + $0x50] sm:$0xff] }
 0x20a   : > { %v1249_v16 = vpop.f32.mrf.mxu0  ;;  %v4313_v54 = vpop.f32.mrf.mxu1  ;;  %v1844_v7 = vsub.f32 %v4022_v47, %v4268_v50  ;;  %v1847_v50 = vsub.f32 %v4022_v47, %v4275_v37 }
 0x20b   : > { %2220 = vmin.xlane.f32.xlu1 %v2219_v6  ;;  %2168 = vmin.xlane.f32.xlu0 %v2167_v3  ;;  %v2178_v12 = vmin.f32 %v1839_v51, %v1840_v2  ;;  %v1842_v31 = vsub.f32 %v3860_v18, %v1249_v16  ;;  %v2235_v58 = vmin.f32 %v4947_v55, %v1883_v49  ;;  %v4949_v3 = vld [vmem:[#allocation5_spill] sm:$0xff]  ;;  %v1913_v51 = vld [vmem:[#allocation2 + $0x58] sm:$0xff] }
 0x20c   : > { %v1654_v42 = vpop.f32.mrf.mxu1  ;;  %v1251_v57 = vpop.f32.mrf.mxu0  ;;  %v1898_v41 = vsub.f32 %v4022_v47, %v4313_v54  ;;  %v1921_v55 = vld [vmem:[#allocation2 + $0x98] sm:$0xff] }
 0x20d   : > { %v1843_v17 = vsub.f32 %v3863_v19, %v1251_v57  ;;  %v1892_v35 = vsub.f32 %v4022_v47, %v1654_v42  ;;  %v2179_v10 = vmin.f32 %v2178_v12, %v1841_v8  ;;  %v1914_v12 = vld [vmem:[#allocation2 + $0x60] sm:$0xff] }
 0x20e   : > { %v4325_v62 = vpop.f32.mrf.mxu1  ;;  %v1253_v13 = vpop.f32.mrf.mxu0  ;;  %v1918_v8 = vld [vmem:[#allocation2 + $0x80] sm:$0xff] }
 0x20f   : > { %2240 = vmin.xlane.f32.xlu0 %v2239_v29  ;;  %2172 = vmin.xlane.f32.xlu1 %v2171_v40  ;;  %v2182_v4 = vmin.f32 %v1842_v31, %v1843_v17  ;;  %v1845_v0 = vsub.f32 %v3860_v18, %v1253_v13  ;;  %v2247_v60 = vmin.f32 %v4948_v14, %v1892_v35  ;;  %v4950_v40 = vld [vmem:[#allocation6_spill] sm:$0xff]  ;;  %v1915_v17 = vld [vmem:[#allocation2 + $0x68] sm:$0xff]  ;;  %v1920_v35 = vld [vmem:[#allocation2 + $0x90] sm:$0xff] }
 0x210   : > { %v1985_v43 = vpop.xlane.xlu1 %1984  ;;  %v1657_v27 = vpop.f32.mrf.mxu1  ;;  %v1901_v42 = vsub.f32 %v4022_v47, %v4325_v62  ;;  %v2255_v57 = vmin.f32 %v4950_v40, %v1898_v41  ;;  %v1911_v62 = vld [vmem:[#allocation2 + $0x48] sm:$0xff] }
 0x211   : > { %v2264_v34 = vmin.f32 %v1904_v24, %v1985_v43  ;;  %v1255_v1 = vpop.f32.mrf.mxu0  ;;  %v1895_v23 = vsub.f32 %v4022_v47, %v1657_v27  ;;  %v2183_v22 = vmin.f32 %v2182_v4, %v1844_v7  ;;  %v1910_v43 = vld [vmem:[#allocation2 + $0x40] sm:$0xff] }
 0x212   : > { %v1977_v9 = vpop.xlane.xlu0 %1976  ;;  %v1846_v33 = vsub.f32 %v3863_v19, %v1255_v1  ;;  %v2259_v47 = vmin.f32 %v4034_v25, %v1901_v42  ;;  %v1932_v42 = vld [vmem:[#allocation2 + $0xf0] sm:$0xff] }
 0x213   : > { %2337 = vst.msk [vmem:[#allocation2 + $0x10] sm:$0xff] %vm2334_vm2, %v2264_v34  ;;  %v2262_v11 = vmin.f32 %v1902_v36, %v1977_v9  ;;  %2232 = vmin.xlane.f32.xlu0 %v2231_v21  ;;  %2244 = vmin.xlane.f32.xlu1 %v2243_v56  ;;  %v2251_v16 = vmin.f32 %v4949_v3, %v1895_v23  ;;  %v1916_v56 = vld [vmem:[#allocation2 + $0x70] sm:$0xff]  ;;  %v1929_v3 = vld [vmem:[#allocation2 + $0xd8] sm:$0xff] }
 0x214   : > { %v1989_v26 = vpop.xlane.xlu1 %1988  ;;  %v2186_v6 = vmin.f32 %v1845_v0, %v1846_v33  ;;  %v1925_v33 = vld [vmem:[#allocation2 + $0xb8] sm:$0xff] }
 0x215   : > { %2335 = vst.msk [vmem:[#allocation2] sm:$0xff] %vm2334_vm2, %v2262_v11  ;;  %v2265_v5 = vmin.f32 %v1905_v48, %v1989_v26  ;;  %v1917_v48 = vld [vmem:[#allocation2 + $0x78] sm:$0xff] }
 0x216   : > { %v1981_v38 = vpop.xlane.xlu0 %1980  ;;  %v2187_v24 = vmin.f32 %v2186_v6, %v1847_v50 }
 0x217   : > { %2338 = vst.msk [vmem:[#allocation2 + $0x18] sm:$0xff] %vm2334_vm2, %v2265_v5  ;;  %v2263_v30 = vmin.f32 %v1903_v61, %v1981_v38  ;;  %2236 = vmin.xlane.f32.xlu1 %v2235_v58  ;;  %2176 = vmin.xlane.f32.xlu0 %v2175_v63 }
 0x219   : > { %2336 = vst.msk [vmem:[#allocation2 + $0x8] sm:$0xff] %vm2334_vm2, %v2263_v30  ;;  %v1919_v30 = vld [vmem:[#allocation2 + $0x88] sm:$0xff] }
 0x21a   : > { %v2001_v39 = vpop.xlane.xlu0 %2000 }
 0x21b   : > { %v2268_v15 = vmin.f32 %v1908_v45, %v2001_v39  ;;  %2248 = vmin.xlane.f32.xlu0 %v2247_v60  ;;  %2180 = vmin.xlane.f32.xlu1 %v2179_v10  ;;  %v1924_v10 = vld [vmem:[#allocation2 + $0xb0] sm:$0xff]  ;;  %v1922_v39 = vld [vmem:[#allocation2 + $0xa0] sm:$0xff] }
 0x21c   : > { %v2005_v18 = vpop.xlane.xlu1 %2004 }
 0x21d   : > { %2341 = vst.msk [vmem:[#allocation2 + $0x30] sm:$0xff] %vm2334_vm2, %v2268_v15  ;;  %v2269_v19 = vmin.f32 %v1909_v44, %v2005_v18  ;;  %v1923_v15 = vld [vmem:[#allocation2 + $0xa8] sm:$0xff] }
 0x21e   : > { %v1993_v52 = vpop.xlane.xlu0 %1992 }
 0x21f   : > { %2342 = vst.msk [vmem:[#allocation2 + $0x38] sm:$0xff] %vm2334_vm2, %v2269_v19  ;;  %v2266_v53 = vmin.f32 %v1906_v32, %v1993_v52  ;;  %2252 = vmin.xlane.f32.xlu1 %v2251_v16  ;;  %2184 = vmin.xlane.f32.xlu0 %v2183_v22  ;;  %v1928_v32 = vld [vmem:[#allocation2 + $0xd0] sm:$0xff]  ;;  %v1926_v52 = vld [vmem:[#allocation2 + $0xc0] sm:$0xff] }
 0x220   : > { %v1997_v54 = vpop.xlane.xlu1 %1996 }
 0x221   : > { %2339 = vst.msk [vmem:[#allocation2 + $0x20] sm:$0xff] %vm2334_vm2, %v2266_v53  ;;  %v2267_v29 = vmin.f32 %v1907_v20, %v1997_v54  ;;  %v1927_v53 = vld [vmem:[#allocation2 + $0xc8] sm:$0xff] }
 0x222   : > { %v2017_v28 = vpop.xlane.xlu0 %2016 }
 0x223   : > { %2340 = vst.msk [vmem:[#allocation2 + $0x28] sm:$0xff] %vm2334_vm2, %v2267_v29  ;;  %v2272_v37 = vmin.f32 %v1912_v46, %v2017_v28  ;;  %2256 = vmin.xlane.f32.xlu0 %v2255_v57  ;;  %2188 = vmin.xlane.f32.xlu1 %v2187_v24  ;;  %v1933_v57 = vld [vmem:[#allocation2 + $0xf8] sm:$0xff] }
 0x224   : > { %v2021_v2 = vpop.xlane.xlu1 %2020 }
 0x225   : > { %2345 = vst.msk [vmem:[#allocation2 + $0x50] sm:$0xff] %vm2334_vm2, %v2272_v37  ;;  %v2273_v36 = vmin.f32 %v1913_v51, %v2021_v2  ;;  %v1930_v51 = vld [vmem:[#allocation2 + $0xe0] sm:$0xff] }
 0x226   : > { %v2009_v49 = vpop.xlane.xlu0 %2008 }
 0x227   : > { %2346 = vst.msk [vmem:[#allocation2 + $0x58] sm:$0xff] %vm2334_vm2, %v2273_v36  ;;  %v2270_v34 = vmin.f32 %v1910_v43, %v2009_v49  ;;  %2260 = vmin.xlane.f32.xlu1 %v2259_v47  ;;  %v1931_v43 = vld [vmem:[#allocation2 + $0xe8] sm:$0xff]  ;;  %v1934_v49 = vld [vmem:[#allocation2 + $0x100] sm:$0xff] }
 0x228   : > { %v2013_v21 = vpop.xlane.xlu1 %2012 }
 0x229   : > { %2343 = vst.msk [vmem:[#allocation2 + $0x40] sm:$0xff] %vm2334_vm2, %v2270_v34  ;;  %v2271_v13 = vmin.f32 %v1911_v62, %v2013_v21 }
 0x22a   : > { %v2033_v9 = vpop.xlane.xlu0 %2032 }
 0x22b   : > { %2344 = vst.msk [vmem:[#allocation2 + $0x48] sm:$0xff] %vm2334_vm2, %v2271_v13  ;;  %v2276_v59 = vmin.f32 %v1916_v56, %v2033_v9  ;;  %v1935_v56 = vld [vmem:[#allocation2 + $0x108] sm:$0xff]  ;;  %v1936_v13 = vld [vmem:[#allocation2 + $0x110] sm:$0xff] }
 0x22c   : > { %v2037_v11 = vpop.xlane.xlu1 %2036 }
 0x22d   : > { %2349 = vst.msk [vmem:[#allocation2 + $0x70] sm:$0xff] %vm2334_vm2, %v2276_v59  ;;  %v2277_v25 = vmin.f32 %v1917_v48, %v2037_v11 }
 0x22e   : > { %v2025_v31 = vpop.xlane.xlu0 %2024 }
 0x22f   : > { %2350 = vst.msk [vmem:[#allocation2 + $0x78] sm:$0xff] %vm2334_vm2, %v2277_v25  ;;  %v2274_v26 = vmin.f32 %v1914_v12, %v2025_v31  ;;  %v1937_v12 = vld [vmem:[#allocation2 + $0x118] sm:$0xff]  ;;  %v1938_v31 = vld [vmem:[#allocation2 + $0x120] sm:$0xff] }
 0x230   : > { %v2029_v61 = vpop.xlane.xlu1 %2028 }
 0x231   : > { %2347 = vst.msk [vmem:[#allocation2 + $0x60] sm:$0xff] %vm2334_vm2, %v2274_v26  ;;  %v2275_v27 = vmin.f32 %v1915_v17, %v2029_v61 }
 0x232   : > { %v2049_v5 = vpop.xlane.xlu0 %2048 }
 0x233   : > { %2348 = vst.msk [vmem:[#allocation2 + $0x68] sm:$0xff] %vm2334_vm2, %v2275_v27  ;;  %v2280_v58 = vmin.f32 %v1920_v35, %v2049_v5  ;;  %v1939_v35 = vld [vmem:[#allocation2 + $0x128] sm:$0xff] }
 0x234   : > { %v2053_v63 = vpop.xlane.xlu1 %2052 }
 0x235   : > { %2353 = vst.msk [vmem:[#allocation2 + $0x90] sm:$0xff] %vm2334_vm2, %v2280_v58  ;;  %v2281_v1 = vmin.f32 %v1921_v55, %v2053_v63  ;;  %v1940_v55 = vld [vmem:[#allocation2 + $0x130] sm:$0xff] }
 0x236   : > { %v2041_v38 = vpop.xlane.xlu0 %2040 }
 0x237   : > { %2354 = vst.msk [vmem:[#allocation2 + $0x98] sm:$0xff] %vm2334_vm2, %v2281_v1  ;;  %v2278_v4 = vmin.f32 %v1918_v8, %v2041_v38  ;;  %v1941_v8 = vld [vmem:[#allocation2 + $0x138] sm:$0xff] }
 0x238   : > { %v2045_v45 = vpop.xlane.xlu1 %2044 }
 0x239   : > { %2351 = vst.msk [vmem:[#allocation2 + $0x80] sm:$0xff] %vm2334_vm2, %v2278_v4  ;;  %v2279_v0 = vmin.f32 %v1919_v30, %v2045_v45  ;;  %v1942_v30 = vld [vmem:[#allocation2 + $0x140] sm:$0xff] }
 0x23a   : > { %v2065_v23 = vpop.xlane.xlu0 %2064 }
 0x23b   : > { %2352 = vst.msk [vmem:[#allocation2 + $0x88] sm:$0xff] %vm2334_vm2, %v2279_v0  ;;  %v2284_v14 = vmin.f32 %v1924_v10, %v2065_v23  ;;  %v1943_v10 = vld [vmem:[#allocation2 + $0x148] sm:$0xff] }
 0x23c   : > { %v2069_v60 = vpop.xlane.xlu1 %2068 }
 0x23d   : > { %2357 = vst.msk [vmem:[#allocation2 + $0xb0] sm:$0xff] %vm2334_vm2, %v2284_v14  ;;  %v2285_v44 = vmin.f32 %v1925_v33, %v2069_v60  ;;  %v1944_v33 = vld [vmem:[#allocation2 + $0x150] sm:$0xff] }
 0x23e   : > { %v2057_v7 = vpop.xlane.xlu0 %2056 }
 0x23f   : > { %2358 = vst.msk [vmem:[#allocation2 + $0xb8] sm:$0xff] %vm2334_vm2, %v2285_v44  ;;  %v2282_v41 = vmin.f32 %v1922_v39, %v2057_v7  ;;  %v1956_v39 = vld [vmem:[#allocation2 + $0x1b0] sm:$0xff]  ;;  %v1945_v44 = vld [vmem:[#allocation2 + $0x158] sm:$0xff] }
 0x240   : > { %v2061_v18 = vpop.xlane.xlu1 %2060 }
 0x241   : > { %2355 = vst.msk [vmem:[#allocation2 + $0xa0] sm:$0xff] %vm2334_vm2, %v2282_v41  ;;  %v2283_v6 = vmin.f32 %v1923_v15, %v2061_v18 }
 0x242   : > { %v2081_v19 = vpop.xlane.xlu0 %2080 }
 0x243   : > { %2356 = vst.msk [vmem:[#allocation2 + $0xa8] sm:$0xff] %vm2334_vm2, %v2283_v6  ;;  %v2288_v16 = vmin.f32 %v1928_v32, %v2081_v19  ;;  %v1957_v32 = vld [vmem:[#allocation2 + $0x1b8] sm:$0xff]  ;;  %v1946_v6 = vld [vmem:[#allocation2 + $0x160] sm:$0xff] }
 0x244   : > { %v2085_v22 = vpop.xlane.xlu1 %2084 }
 0x245   : > { %2361 = vst.msk [vmem:[#allocation2 + $0xd0] sm:$0xff] %vm2334_vm2, %v2288_v16  ;;  %v2289_v20 = vmin.f32 %v1929_v3, %v2085_v22 }
 0x246   : > { %v2073_v50 = vpop.xlane.xlu0 %2072 }
 0x247   : > { %2362 = vst.msk [vmem:[#allocation2 + $0xd8] sm:$0xff] %vm2334_vm2, %v2289_v20  ;;  %v2286_v54 = vmin.f32 %v1926_v52, %v2073_v50  ;;  %v1960_v52 = vld [vmem:[#allocation2 + $0x1d0] sm:$0xff]  ;;  %v1947_v20 = vld [vmem:[#allocation2 + $0x168] sm:$0xff] }
 0x248   : > { %v2077_v46 = vpop.xlane.xlu1 %2076 }
 0x249   : > { %2359 = vst.msk [vmem:[#allocation2 + $0xc0] sm:$0xff] %vm2334_vm2, %v2286_v54  ;;  %v2287_v29 = vmin.f32 %v1927_v53, %v2077_v46 }
 0x24a   : > { %v2097_v40 = vpop.xlane.xlu0 %2096 }
 0x24b   : > { %2360 = vst.msk [vmem:[#allocation2 + $0xc8] sm:$0xff] %vm2334_vm2, %v2287_v29  ;;  %v2292_v24 = vmin.f32 %v1932_v42, %v2097_v40  ;;  %v1958_v42 = vld [vmem:[#allocation2 + $0x1c0] sm:$0xff]  ;;  %v1961_v29 = vld [vmem:[#allocation2 + $0x1d8] sm:$0xff] }
 0x24c   : > { %v2101_v28 = vpop.xlane.xlu1 %2100 }
 0x24d   : > { %2365 = vst.msk [vmem:[#allocation2 + $0xf0] sm:$0xff] %vm2334_vm2, %v2292_v24  ;;  %v2293_v37 = vmin.f32 %v1933_v57, %v2101_v28 }
 0x24e   : > { %v2089_v2 = vpop.xlane.xlu0 %2088 }
 0x24f   : > { %2366 = vst.msk [vmem:[#allocation2 + $0xf8] sm:$0xff] %vm2334_vm2, %v2293_v37  ;;  %v2290_v36 = vmin.f32 %v1930_v51, %v2089_v2  ;;  %v1959_v51 = vld [vmem:[#allocation2 + $0x1c8] sm:$0xff]  ;;  %v1948_v37 = vld [vmem:[#allocation2 + $0x170] sm:$0xff] }
 0x250   : > { %v2093_v47 = vpop.xlane.xlu1 %2092 }
 0x251   : > { %2363 = vst.msk [vmem:[#allocation2 + $0xe0] sm:$0xff] %vm2334_vm2, %v2290_v36  ;;  %v2291_v62 = vmin.f32 %v1931_v43, %v2093_v47 }
 0x252   : > { %v2105_v34 = vpop.xlane.xlu0 %2104 }
 0x253   : > { %2364 = vst.msk [vmem:[#allocation2 + $0xe8] sm:$0xff] %vm2334_vm2, %v2291_v62  ;;  %v2294_v21 = vmin.f32 %v1934_v49, %v2105_v34  ;;  %v1964_v49 = vld [vmem:[#allocation2 + $0x1f0] sm:$0xff]  ;;  %v1949_v62 = vld [vmem:[#allocation2 + $0x178] sm:$0xff] }
 0x255   : > { %2367 = vst.msk [vmem:[#allocation2 + $0x100] sm:$0xff] %vm2334_vm2, %v2294_v21 }
 0x256   : > { %v2109_v9 = vpop.xlane.xlu1 %2108  ;;  %v2113_v48 = vpop.xlane.xlu0 %2112 }
 0x257   : > { %v2295_v59 = vmin.f32 %v1935_v56, %v2109_v9  ;;  %v2296_v11 = vmin.f32 %v1936_v13, %v2113_v48  ;;  %v1962_v9 = vld [vmem:[#allocation2 + $0x1e0] sm:$0xff]  ;;  %v1965_v48 = vld [vmem:[#allocation2 + $0x1f8] sm:$0xff] }
 0x259   : > { %2368 = vst.msk [vmem:[#allocation2 + $0x108] sm:$0xff] %vm2334_vm2, %v2295_v59  ;;  %2369 = vst.msk [vmem:[#allocation2 + $0x110] sm:$0xff] %vm2334_vm2, %v2296_v11 }
 0x25a   : > { %v2117_v25 = vpop.xlane.xlu1 %2116 }
 0x25b   : > { %v2297_v17 = vmin.f32 %v1937_v12, %v2117_v25 }
 0x25c   : > { %v2121_v26 = vpop.xlane.xlu0 %2120 }
 0x25d   : > { %2370 = vst.msk [vmem:[#allocation2 + $0x118] sm:$0xff] %vm2334_vm2, %v2297_v17  ;;  %v2298_v61 = vmin.f32 %v1938_v31, %v2121_v26  ;;  %v1963_v31 = vld [vmem:[#allocation2 + $0x1e8] sm:$0xff]  ;;  %v1950_v17 = vld [vmem:[#allocation2 + $0x180] sm:$0xff] }
 0x25f   : > { %2371 = vst.msk [vmem:[#allocation2 + $0x120] sm:$0xff] %vm2334_vm2, %v2298_v61 }
 0x260   : > { %v2125_v27 = vpop.xlane.xlu1 %2124 }
 0x261   : > { %v2299_v5 = vmin.f32 %v1939_v35, %v2125_v27 }
 0x263   : > { %2372 = vst.msk [vmem:[#allocation2 + $0x128] sm:$0xff] %vm2334_vm2, %v2299_v5  ;;  %v1968_v5 = vld [vmem:[#allocation2 + $0x210] sm:$0xff] }
 0x264   : > { %v2129_v58 = vpop.xlane.xlu0 %2128 }
 0x265   : > { %v2300_v63 = vmin.f32 %v1940_v55, %v2129_v58  ;;  %v1951_v55 = vld [vmem:[#allocation2 + $0x188] sm:$0xff] }
 0x267   : > { %2373 = vst.msk [vmem:[#allocation2 + $0x130] sm:$0xff] %vm2334_vm2, %v2300_v63 }
 0x268   : > { %v2133_v1 = vpop.xlane.xlu1 %2132 }
 0x269   : > { %v2301_v38 = vmin.f32 %v1941_v8, %v2133_v1 }
 0x26b   : > { %2374 = vst.msk [vmem:[#allocation2 + $0x138] sm:$0xff] %vm2334_vm2, %v2301_v38  ;;  %v1966_v38 = vld [vmem:[#allocation2 + $0x200] sm:$0xff] }
 0x26c   : > { %v2137_v4 = vpop.xlane.xlu0 %2136 }
 0x26d   : > { %v2302_v45 = vmin.f32 %v1942_v30, %v2137_v4  ;;  %v1969_v30 = vld [vmem:[#allocation2 + $0x218] sm:$0xff] }
 0x26f   : > { %2375 = vst.msk [vmem:[#allocation2 + $0x140] sm:$0xff] %vm2334_vm2, %v2302_v45 }
 0x270   : > { %v2141_v0 = vpop.xlane.xlu1 %2140 }
 0x271   : > { %v2303_v23 = vmin.f32 %v1943_v10, %v2141_v0 }
 0x273   : > { %2376 = vst.msk [vmem:[#allocation2 + $0x148] sm:$0xff] %vm2334_vm2, %v2303_v23  ;;  %v1967_v23 = vld [vmem:[#allocation2 + $0x208] sm:$0xff] }
 0x274   : > { %v2145_v14 = vpop.xlane.xlu0 %2144 }
 0x275   : > { %v2304_v60 = vmin.f32 %v1944_v33, %v2145_v14  ;;  %v1952_v33 = vld [vmem:[#allocation2 + $0x190] sm:$0xff] }
 0x277   : > { %2377 = vst.msk [vmem:[#allocation2 + $0x150] sm:$0xff] %vm2334_vm2, %v2304_v60 }
 0x278   : > { %v2193_v7 = vpop.xlane.xlu0 %2192  ;;  %v2149_v15 = vpop.xlane.xlu1 %2148 }
 0x279   : > { %v2316_v41 = vmin.f32 %v1956_v39, %v2193_v7  ;;  %v2305_v18 = vmin.f32 %v1945_v44, %v2149_v15  ;;  %v1970_v7 = vld [vmem:[#allocation2 + $0x220] sm:$0xff]  ;;  %v1953_v15 = vld [vmem:[#allocation2 + $0x198] sm:$0xff] }
 0x27b   : > { %2389 = vst.msk [vmem:[#allocation2 + $0x1b0] sm:$0xff] %vm2334_vm2, %v2316_v41  ;;  %2378 = vst.msk [vmem:[#allocation2 + $0x158] sm:$0xff] %vm2334_vm2, %v2305_v18 }
 0x27c   : > { %v2197_v19 = vpop.xlane.xlu1 %2196  ;;  %v2153_v3 = vpop.xlane.xlu0 %2152 }
 0x27d   : > { %v2317_v16 = vmin.f32 %v1957_v32, %v2197_v19  ;;  %v2306_v22 = vmin.f32 %v1946_v6, %v2153_v3  ;;  %v1971_v19 = vld [vmem:[#allocation2 + $0x228] sm:$0xff]  ;;  %v1954_v3 = vld [vmem:[#allocation2 + $0x1a0] sm:$0xff] }
 0x27f   : > { %2390 = vst.msk [vmem:[#allocation2 + $0x1b8] sm:$0xff] %vm2334_vm2, %v2317_v16  ;;  %2379 = vst.msk [vmem:[#allocation2 + $0x160] sm:$0xff] %vm2334_vm2, %v2306_v22 }
 0x280   : > { %v2209_v50 = vpop.xlane.xlu0 %2208  ;;  %v2157_v53 = vpop.xlane.xlu1 %2156 }
 0x281   : > { %v2320_v54 = vmin.f32 %v1960_v52, %v2209_v50  ;;  %v2307_v46 = vmin.f32 %v1947_v20, %v2157_v53  ;;  %v1972_v50 = vld [vmem:[#allocation2 + $0x230] sm:$0xff]  ;;  %v1955_v53 = vld [vmem:[#allocation2 + $0x1a8] sm:$0xff] }
 0x283   : > { %2393 = vst.msk [vmem:[#allocation2 + $0x1d0] sm:$0xff] %vm2334_vm2, %v2320_v54  ;;  %2380 = vst.msk [vmem:[#allocation2 + $0x168] sm:$0xff] %vm2334_vm2, %v2307_v46 }
 0x284   : > { %v2201_v40 = vpop.xlane.xlu0 %2200  ;;  %v2213_v57 = vpop.xlane.xlu1 %2212 }
 0x285   : > { %v2318_v24 = vmin.f32 %v1958_v42, %v2201_v40  ;;  %v2321_v28 = vmin.f32 %v1961_v29, %v2213_v57  ;;  %v1973_v40 = vld [vmem:[#allocation2 + $0x238] sm:$0xff] }
 0x287   : > { %2391 = vst.msk [vmem:[#allocation2 + $0x1c0] sm:$0xff] %vm2334_vm2, %v2318_v24  ;;  %2394 = vst.msk [vmem:[#allocation2 + $0x1d8] sm:$0xff] %vm2334_vm2, %v2321_v28 }
 0x288   : > { %v2205_v2 = vpop.xlane.xlu1 %2204  ;;  %v2161_v43 = vpop.xlane.xlu0 %2160 }
 0x289   : > { %v2319_v36 = vmin.f32 %v1959_v51, %v2205_v2  ;;  %v2308_v47 = vmin.f32 %v1948_v37, %v2161_v43 }
 0x28b   : > { %2392 = vst.msk [vmem:[#allocation2 + $0x1c8] sm:$0xff] %vm2334_vm2, %v2319_v36  ;;  %2381 = vst.msk [vmem:[#allocation2 + $0x170] sm:$0xff] %vm2334_vm2, %v2308_v47 }
 0x28c   : > { %v2225_v34 = vpop.xlane.xlu0 %2224  ;;  %v2165_v21 = vpop.xlane.xlu1 %2164 }
 0x28d   : > { %v2324_v56 = vmin.f32 %v1964_v49, %v2225_v34  ;;  %v2309_v13 = vmin.f32 %v1949_v62, %v2165_v21 }
 0x28f   : > { %2397 = vst.msk [vmem:[#allocation2 + $0x1f0] sm:$0xff] %vm2334_vm2, %v2324_v56  ;;  %2382 = vst.msk [vmem:[#allocation2 + $0x178] sm:$0xff] %vm2334_vm2, %v2309_v13 }
 0x290   : > { %v2217_v59 = vpop.xlane.xlu0 %2216  ;;  %v2229_v11 = vpop.xlane.xlu1 %2228 }
 0x291   : > { %v2322_v12 = vmin.f32 %v1962_v9, %v2217_v59  ;;  %v2325_v25 = vmin.f32 %v1965_v48, %v2229_v11 }
 0x293   : > { %2395 = vst.msk [vmem:[#allocation2 + $0x1e0] sm:$0xff] %vm2334_vm2, %v2322_v12  ;;  %2398 = vst.msk [vmem:[#allocation2 + $0x1f8] sm:$0xff] %vm2334_vm2, %v2325_v25 }
 0x294   : > { %v2221_v26 = vpop.xlane.xlu1 %2220  ;;  %v2169_v61 = vpop.xlane.xlu0 %2168 }
 0x295   : > { %v2323_v35 = vmin.f32 %v1963_v31, %v2221_v26  ;;  %v2310_v27 = vmin.f32 %v1950_v17, %v2169_v61 }
 0x297   : > { %2396 = vst.msk [vmem:[#allocation2 + $0x1e8] sm:$0xff] %vm2334_vm2, %v2323_v35  ;;  %2383 = vst.msk [vmem:[#allocation2 + $0x180] sm:$0xff] %vm2334_vm2, %v2310_v27 }
 0x298   : > { %v2241_v58 = vpop.xlane.xlu0 %2240  ;;  %v2173_v63 = vpop.xlane.xlu1 %2172 }
 0x299   : > { %v2328_v8 = vmin.f32 %v1968_v5, %v2241_v58  ;;  %v2311_v1 = vmin.f32 %v1951_v55, %v2173_v63 }
 0x29b   : > { %2401 = vst.msk [vmem:[#allocation2 + $0x210] sm:$0xff] %vm2334_vm2, %v2328_v8  ;;  %2384 = vst.msk [vmem:[#allocation2 + $0x188] sm:$0xff] %vm2334_vm2, %v2311_v1 }
 0x29c   : > { %v2233_v4 = vpop.xlane.xlu0 %2232  ;;  %v2245_v45 = vpop.xlane.xlu1 %2244 }
 0x29d   : > { %v2326_v10 = vmin.f32 %v1966_v38, %v2233_v4  ;;  %v2329_v0 = vmin.f32 %v1969_v30, %v2245_v45 }
 0x29f   : > { %2399 = vst.msk [vmem:[#allocation2 + $0x200] sm:$0xff] %vm2334_vm2, %v2326_v10  ;;  %2402 = vst.msk [vmem:[#allocation2 + $0x218] sm:$0xff] %vm2334_vm2, %v2329_v0 }
 0x2a0   : > { %v2237_v14 = vpop.xlane.xlu1 %2236  ;;  %v2177_v60 = vpop.xlane.xlu0 %2176 }
 0x2a1   : > { %v2327_v39 = vmin.f32 %v1967_v23, %v2237_v14  ;;  %v2312_v44 = vmin.f32 %v1952_v33, %v2177_v60 }
 0x2a3   : > { %2400 = vst.msk [vmem:[#allocation2 + $0x208] sm:$0xff] %vm2334_vm2, %v2327_v39  ;;  %2385 = vst.msk [vmem:[#allocation2 + $0x190] sm:$0xff] %vm2334_vm2, %v2312_v44 }
 0x2a4   : > { %v2249_v41 = vpop.xlane.xlu0 %2248  ;;  %v2181_v18 = vpop.xlane.xlu1 %2180 }
 0x2a5   : > { %v2330_v32 = vmin.f32 %v1970_v7, %v2249_v41  ;;  %v2313_v6 = vmin.f32 %v1953_v15, %v2181_v18 }
 0x2a7   : > { %2403 = vst.msk [vmem:[#allocation2 + $0x220] sm:$0xff] %vm2334_vm2, %v2330_v32  ;;  %2386 = vst.msk [vmem:[#allocation2 + $0x198] sm:$0xff] %vm2334_vm2, %v2313_v6 }
 0x2a8   : > { %v2253_v16 = vpop.xlane.xlu1 %2252  ;;  %v2185_v22 = vpop.xlane.xlu0 %2184 }
 0x2a9   : > { %v2331_v52 = vmin.f32 %v1971_v19, %v2253_v16  ;;  %v2314_v20 = vmin.f32 %v1954_v3, %v2185_v22 }
 0x2ab   : > { %2404 = vst.msk [vmem:[#allocation2 + $0x228] sm:$0xff] %vm2334_vm2, %v2331_v52  ;;  %2387 = vst.msk [vmem:[#allocation2 + $0x1a0] sm:$0xff] %vm2334_vm2, %v2314_v20 }
 0x2ac   : > { %v2257_v54 = vpop.xlane.xlu0 %2256  ;;  %v2189_v46 = vpop.xlane.xlu1 %2188 }
 0x2ad   : > { %v2332_v42 = vmin.f32 %v1972_v50, %v2257_v54  ;;  %v2315_v29 = vmin.f32 %v1955_v53, %v2189_v46 }
 0x2af   : > { %2405 = vst.msk [vmem:[#allocation2 + $0x230] sm:$0xff] %vm2334_vm2, %v2332_v42  ;;  %2388 = vst.msk [vmem:[#allocation2 + $0x1a8] sm:$0xff] %vm2334_vm2, %v2315_v29  ;;  %2410 = sbr.rel (%p2940_p7) target bundleno = 751 (0x2ef), region = 44 }
 0x2b0   : > { %v2261_v57 = vpop.xlane.xlu1 %2260 }
 0x2b1   : > { %v2333_v24 = vmin.f32 %v1973_v40, %v2261_v57 }
 0x2b3   : > { %2406 = vst.msk [vmem:[#allocation2 + $0x238] sm:$0xff] %vm2334_vm2, %v2333_v24 }
 0x2b4   : > { %v2411_v28 = vld [vmem:[#allocation2] sm:$0xff]  ;;  %v2412_v37 = vld [vmem:[#allocation2 + $0x8] sm:$0xff]  ;;  %v2413_v36 = vld [vmem:[#allocation2 + $0x10] sm:$0xff] }
 0x2b5   : > { %v2483_v51 = vld [vmem:[%s4941_s3] sm:$0xff]  ;;  %v2484_v43 = vld [vmem:[%s4941_s3 + $0x8] sm:$0xff]  ;;  %v2485_v47 = vld [vmem:[%s4941_s3 + $0x10] sm:$0xff] }
 0x2b6   : > { %v2555_v2 = vadd.f32 %v2483_v51, %v2411_v28  ;;  %v2556_v49 = vadd.f32 %v2484_v43, %v2412_v37  ;;  %v2557_v62 = vadd.f32 %v2485_v47, %v2413_v36  ;;  %v2414_v34 = vld [vmem:[#allocation2 + $0x18] sm:$0xff]  ;;  %v2415_v56 = vld [vmem:[#allocation2 + $0x20] sm:$0xff]  ;;  %v2416_v48 = vld [vmem:[#allocation2 + $0x28] sm:$0xff] }
 0x2b7   : > { %v2486_v21 = vld [vmem:[%s4941_s3 + $0x18] sm:$0xff]  ;;  %v2487_v9 = vld [vmem:[%s4941_s3 + $0x20] sm:$0xff]  ;;  %v2488_v59 = vld [vmem:[%s4941_s3 + $0x28] sm:$0xff] }
 0x2b8   : > { %2627 = vst.msk [vmem:[%s4942_s4] sm:$0xff] %vm2334_vm2, %v2555_v2  ;;  %v2558_v13 = vadd.f32 %v2486_v21, %v2414_v34  ;;  %2628 = vst.msk [vmem:[%s4942_s4 + $0x8] sm:$0xff] %vm2334_vm2, %v2556_v49  ;;  %v2559_v11 = vadd.f32 %v2487_v9, %v2415_v56  ;;  %v2560_v12 = vadd.f32 %v2488_v59, %v2416_v48  ;;  %v2417_v25 = vld [vmem:[#allocation2 + $0x30] sm:$0xff]  ;;  %v2418_v17 = vld [vmem:[#allocation2 + $0x38] sm:$0xff] }
 0x2b9   : > { %2629 = vst.msk [vmem:[%s4942_s4 + $0x10] sm:$0xff] %vm2334_vm2, %v2557_v62  ;;  %v2489_v31 = vld [vmem:[%s4941_s3 + $0x30] sm:$0xff]  ;;  %v2490_v61 = vld [vmem:[%s4941_s3 + $0x38] sm:$0xff]  ;;  %v2419_v35 = vld [vmem:[#allocation2 + $0x40] sm:$0xff] }
 0x2ba   : > { %2630 = vst.msk [vmem:[%s4942_s4 + $0x18] sm:$0xff] %vm2334_vm2, %v2558_v13  ;;  %v2561_v26 = vadd.f32 %v2489_v31, %v2417_v25  ;;  %v2491_v27 = vld [vmem:[%s4941_s3 + $0x40] sm:$0xff]  ;;  %2631 = vst.msk [vmem:[%s4942_s4 + $0x20] sm:$0xff] %vm2334_vm2, %v2559_v11  ;;  %v2562_v5 = vadd.f32 %v2490_v61, %v2418_v17  ;;  %v2420_v58 = vld [vmem:[#allocation2 + $0x48] sm:$0xff] }
 0x2bb   : > { %2632 = vst.msk [vmem:[%s4942_s4 + $0x28] sm:$0xff] %vm2334_vm2, %v2560_v12  ;;  %v2563_v55 = vadd.f32 %v2491_v27, %v2419_v35  ;;  %v2492_v63 = vld [vmem:[%s4941_s3 + $0x48] sm:$0xff]  ;;  %v2421_v8 = vld [vmem:[#allocation2 + $0x50] sm:$0xff]  ;;  %v2422_v30 = vld [vmem:[#allocation2 + $0x58] sm:$0xff] }
 0x2bc   : > { %2633 = vst.msk [vmem:[%s4942_s4 + $0x30] sm:$0xff] %vm2334_vm2, %v2561_v26  ;;  %v2564_v1 = vadd.f32 %v2492_v63, %v2420_v58  ;;  %v2493_v38 = vld [vmem:[%s4941_s3 + $0x50] sm:$0xff]  ;;  %v2494_v4 = vld [vmem:[%s4941_s3 + $0x58] sm:$0xff]  ;;  %2634 = vst.msk [vmem:[%s4942_s4 + $0x38] sm:$0xff] %vm2334_vm2, %v2562_v5 }
 0x2bd   : > { %2635 = vst.msk [vmem:[%s4942_s4 + $0x40] sm:$0xff] %vm2334_vm2, %v2563_v55  ;;  %v2565_v45 = vadd.f32 %v2493_v38, %v2421_v8  ;;  %v2566_v10 = vadd.f32 %v2494_v4, %v2422_v30  ;;  %v2423_v0 = vld [vmem:[#allocation2 + $0x60] sm:$0xff]  ;;  %v2424_v33 = vld [vmem:[#allocation2 + $0x68] sm:$0xff]  ;;  %v2425_v39 = vld [vmem:[#allocation2 + $0x70] sm:$0xff] }
 0x2be   : > { %v2495_v23 = vld [vmem:[%s4941_s3 + $0x60] sm:$0xff]  ;;  %2636 = vst.msk [vmem:[%s4942_s4 + $0x48] sm:$0xff] %vm2334_vm2, %v2564_v1  ;;  %v2496_v60 = vld [vmem:[%s4941_s3 + $0x68] sm:$0xff]  ;;  %v2497_v44 = vld [vmem:[%s4941_s3 + $0x70] sm:$0xff] }
 0x2bf   : > { %v2567_v14 = vadd.f32 %v2495_v23, %v2423_v0  ;;  %2637 = vst.msk [vmem:[%s4942_s4 + $0x50] sm:$0xff] %vm2334_vm2, %v2565_v45  ;;  %2638 = vst.msk [vmem:[%s4942_s4 + $0x58] sm:$0xff] %vm2334_vm2, %v2566_v10  ;;  %v2568_v7 = vadd.f32 %v2496_v60, %v2424_v33  ;;  %v2569_v15 = vadd.f32 %v2497_v44, %v2425_v39  ;;  %v2426_v41 = vld [vmem:[#allocation2 + $0x78] sm:$0xff]  ;;  %v2427_v32 = vld [vmem:[#allocation2 + $0x80] sm:$0xff] }
 0x2c0   : > { %v2498_v18 = vld [vmem:[%s4941_s3 + $0x78] sm:$0xff]  ;;  %v2499_v19 = vld [vmem:[%s4941_s3 + $0x80] sm:$0xff]  ;;  %v2428_v3 = vld [vmem:[#allocation2 + $0x88] sm:$0xff] }
 0x2c1   : > { %2639 = vst.msk [vmem:[%s4942_s4 + $0x60] sm:$0xff] %vm2334_vm2, %v2567_v14  ;;  %v2570_v6 = vadd.f32 %v2498_v18, %v2426_v41  ;;  %v2500_v16 = vld [vmem:[%s4941_s3 + $0x88] sm:$0xff]  ;;  %2640 = vst.msk [vmem:[%s4942_s4 + $0x68] sm:$0xff] %vm2334_vm2, %v2568_v7  ;;  %v2571_v22 = vadd.f32 %v2499_v19, %v2427_v32  ;;  %v2429_v20 = vld [vmem:[#allocation2 + $0x90] sm:$0xff] }
 0x2c2   : > { %2641 = vst.msk [vmem:[%s4942_s4 + $0x70] sm:$0xff] %vm2334_vm2, %v2569_v15  ;;  %v2572_v52 = vadd.f32 %v2500_v16, %v2428_v3  ;;  %v2501_v50 = vld [vmem:[%s4941_s3 + $0x90] sm:$0xff]  ;;  %v2430_v53 = vld [vmem:[#allocation2 + $0x98] sm:$0xff]  ;;  %v2431_v42 = vld [vmem:[#allocation2 + $0xa0] sm:$0xff] }
 0x2c3   : > { %2642 = vst.msk [vmem:[%s4942_s4 + $0x78] sm:$0xff] %vm2334_vm2, %v2570_v6  ;;  %v2573_v54 = vadd.f32 %v2501_v50, %v2429_v20  ;;  %v2502_v46 = vld [vmem:[%s4941_s3 + $0x98] sm:$0xff]  ;;  %v2503_v29 = vld [vmem:[%s4941_s3 + $0xa0] sm:$0xff]  ;;  %2643 = vst.msk [vmem:[%s4942_s4 + $0x80] sm:$0xff] %vm2334_vm2, %v2571_v22 }
 0x2c4   : > { %2644 = vst.msk [vmem:[%s4942_s4 + $0x88] sm:$0xff] %vm2334_vm2, %v2572_v52  ;;  %v2574_v40 = vadd.f32 %v2502_v46, %v2430_v53  ;;  %v2575_v57 = vadd.f32 %v2503_v29, %v2431_v42  ;;  %v2432_v24 = vld [vmem:[#allocation2 + $0xa8] sm:$0xff]  ;;  %v2433_v51 = vld [vmem:[#allocation2 + $0xb0] sm:$0xff]  ;;  %v2434_v43 = vld [vmem:[#allocation2 + $0xb8] sm:$0xff] }
 0x2c5   : > { %v2504_v28 = vld [vmem:[%s4941_s3 + $0xa8] sm:$0xff]  ;;  %2645 = vst.msk [vmem:[%s4942_s4 + $0x90] sm:$0xff] %vm2334_vm2, %v2573_v54  ;;  %v2505_v2 = vld [vmem:[%s4941_s3 + $0xb0] sm:$0xff]  ;;  %v2506_v36 = vld [vmem:[%s4941_s3 + $0xb8] sm:$0xff] }
 0x2c6   : > { %v2576_v37 = vadd.f32 %v2504_v28, %v2432_v24  ;;  %2646 = vst.msk [vmem:[%s4942_s4 + $0x98] sm:$0xff] %vm2334_vm2, %v2574_v40  ;;  %2647 = vst.msk [vmem:[%s4942_s4 + $0xa0] sm:$0xff] %vm2334_vm2, %v2575_v57  ;;  %v2577_v47 = vadd.f32 %v2505_v2, %v2433_v51  ;;  %v2578_v49 = vadd.f32 %v2506_v36, %v2434_v43  ;;  %v2435_v62 = vld [vmem:[#allocation2 + $0xc0] sm:$0xff]  ;;  %v2436_v21 = vld [vmem:[#allocation2 + $0xc8] sm:$0xff] }
 0x2c7   : > { %v2507_v34 = vld [vmem:[%s4941_s3 + $0xc0] sm:$0xff]  ;;  %v2508_v13 = vld [vmem:[%s4941_s3 + $0xc8] sm:$0xff]  ;;  %v2437_v9 = vld [vmem:[#allocation2 + $0xd0] sm:$0xff] }
 0x2c8   : > { %2648 = vst.msk [vmem:[%s4942_s4 + $0xa8] sm:$0xff] %vm2334_vm2, %v2576_v37  ;;  %v2579_v56 = vadd.f32 %v2507_v34, %v2435_v62  ;;  %v2509_v48 = vld [vmem:[%s4941_s3 + $0xd0] sm:$0xff]  ;;  %2649 = vst.msk [vmem:[%s4942_s4 + $0xb0] sm:$0xff] %vm2334_vm2, %v2577_v47  ;;  %v2580_v59 = vadd.f32 %v2508_v13, %v2436_v21  ;;  %v2438_v12 = vld [vmem:[#allocation2 + $0xd8] sm:$0xff] }
 0x2c9   : > { %2650 = vst.msk [vmem:[%s4942_s4 + $0xb8] sm:$0xff] %vm2334_vm2, %v2578_v49  ;;  %v2581_v11 = vadd.f32 %v2509_v48, %v2437_v9  ;;  %v2510_v25 = vld [vmem:[%s4941_s3 + $0xd8] sm:$0xff]  ;;  %v2439_v31 = vld [vmem:[#allocation2 + $0xe0] sm:$0xff]  ;;  %v2440_v61 = vld [vmem:[#allocation2 + $0xe8] sm:$0xff] }
 0x2ca   : > { %2651 = vst.msk [vmem:[%s4942_s4 + $0xc0] sm:$0xff] %vm2334_vm2, %v2579_v56  ;;  %v2582_v17 = vadd.f32 %v2510_v25, %v2438_v12  ;;  %v2511_v26 = vld [vmem:[%s4941_s3 + $0xe0] sm:$0xff]  ;;  %v2512_v35 = vld [vmem:[%s4941_s3 + $0xe8] sm:$0xff]  ;;  %2652 = vst.msk [vmem:[%s4942_s4 + $0xc8] sm:$0xff] %vm2334_vm2, %v2580_v59 }
 0x2cb   : > { %2653 = vst.msk [vmem:[%s4942_s4 + $0xd0] sm:$0xff] %vm2334_vm2, %v2581_v11  ;;  %v2583_v27 = vadd.f32 %v2511_v26, %v2439_v31  ;;  %v2584_v5 = vadd.f32 %v2512_v35, %v2440_v61  ;;  %v2441_v55 = vld [vmem:[#allocation2 + $0xf0] sm:$0xff]  ;;  %v2442_v63 = vld [vmem:[#allocation2 + $0xf8] sm:$0xff]  ;;  %v2443_v38 = vld [vmem:[#allocation2 + $0x100] sm:$0xff] }
 0x2cc   : > { %v2513_v58 = vld [vmem:[%s4941_s3 + $0xf0] sm:$0xff]  ;;  %2654 = vst.msk [vmem:[%s4942_s4 + $0xd8] sm:$0xff] %vm2334_vm2, %v2582_v17  ;;  %v2514_v1 = vld [vmem:[%s4941_s3 + $0xf8] sm:$0xff]  ;;  %v2515_v30 = vld [vmem:[%s4941_s3 + $0x100] sm:$0xff] }
 0x2cd   : > { %v2585_v8 = vadd.f32 %v2513_v58, %v2441_v55  ;;  %2655 = vst.msk [vmem:[%s4942_s4 + $0xe0] sm:$0xff] %vm2334_vm2, %v2583_v27  ;;  %2656 = vst.msk [vmem:[%s4942_s4 + $0xe8] sm:$0xff] %vm2334_vm2, %v2584_v5  ;;  %v2586_v4 = vadd.f32 %v2514_v1, %v2442_v63  ;;  %v2587_v45 = vadd.f32 %v2515_v30, %v2443_v38  ;;  %v2444_v10 = vld [vmem:[#allocation2 + $0x108] sm:$0xff]  ;;  %v2445_v23 = vld [vmem:[#allocation2 + $0x110] sm:$0xff] }
 0x2ce   : > { %v2516_v0 = vld [vmem:[%s4941_s3 + $0x108] sm:$0xff]  ;;  %v2517_v14 = vld [vmem:[%s4941_s3 + $0x110] sm:$0xff]  ;;  %v2446_v60 = vld [vmem:[#allocation2 + $0x118] sm:$0xff] }
 0x2cf   : > { %2657 = vst.msk [vmem:[%s4942_s4 + $0xf0] sm:$0xff] %vm2334_vm2, %v2585_v8  ;;  %v2588_v33 = vadd.f32 %v2516_v0, %v2444_v10  ;;  %v2518_v39 = vld [vmem:[%s4941_s3 + $0x118] sm:$0xff]  ;;  %2658 = vst.msk [vmem:[%s4942_s4 + $0xf8] sm:$0xff] %vm2334_vm2, %v2586_v4  ;;  %v2589_v44 = vadd.f32 %v2517_v14, %v2445_v23  ;;  %v2447_v15 = vld [vmem:[#allocation2 + $0x120] sm:$0xff] }
 0x2d0   : > { %2659 = vst.msk [vmem:[%s4942_s4 + $0x100] sm:$0xff] %vm2334_vm2, %v2587_v45  ;;  %v2590_v7 = vadd.f32 %v2518_v39, %v2446_v60  ;;  %v2519_v41 = vld [vmem:[%s4941_s3 + $0x120] sm:$0xff]  ;;  %v2448_v18 = vld [vmem:[#allocation2 + $0x128] sm:$0xff]  ;;  %v2449_v19 = vld [vmem:[#allocation2 + $0x130] sm:$0xff] }
 0x2d1   : > { %2660 = vst.msk [vmem:[%s4942_s4 + $0x108] sm:$0xff] %vm2334_vm2, %v2588_v33  ;;  %v2591_v32 = vadd.f32 %v2519_v41, %v2447_v15  ;;  %v2520_v6 = vld [vmem:[%s4941_s3 + $0x128] sm:$0xff]  ;;  %v2521_v3 = vld [vmem:[%s4941_s3 + $0x130] sm:$0xff]  ;;  %2661 = vst.msk [vmem:[%s4942_s4 + $0x110] sm:$0xff] %vm2334_vm2, %v2589_v44 }
 0x2d2   : > { %2662 = vst.msk [vmem:[%s4942_s4 + $0x118] sm:$0xff] %vm2334_vm2, %v2590_v7  ;;  %v2592_v16 = vadd.f32 %v2520_v6, %v2448_v18  ;;  %v2593_v22 = vadd.f32 %v2521_v3, %v2449_v19  ;;  %v2450_v52 = vld [vmem:[#allocation2 + $0x138] sm:$0xff]  ;;  %v2451_v50 = vld [vmem:[#allocation2 + $0x140] sm:$0xff]  ;;  %v2452_v46 = vld [vmem:[#allocation2 + $0x148] sm:$0xff] }
 0x2d3   : > { %v2522_v20 = vld [vmem:[%s4941_s3 + $0x138] sm:$0xff]  ;;  %2663 = vst.msk [vmem:[%s4942_s4 + $0x120] sm:$0xff] %vm2334_vm2, %v2591_v32  ;;  %v2523_v54 = vld [vmem:[%s4941_s3 + $0x140] sm:$0xff]  ;;  %v2524_v42 = vld [vmem:[%s4941_s3 + $0x148] sm:$0xff] }
 0x2d4   : > { %v2594_v53 = vadd.f32 %v2522_v20, %v2450_v52  ;;  %2664 = vst.msk [vmem:[%s4942_s4 + $0x128] sm:$0xff] %vm2334_vm2, %v2592_v16  ;;  %2665 = vst.msk [vmem:[%s4942_s4 + $0x130] sm:$0xff] %vm2334_vm2, %v2593_v22  ;;  %v2595_v29 = vadd.f32 %v2523_v54, %v2451_v50  ;;  %v2596_v40 = vadd.f32 %v2524_v42, %v2452_v46  ;;  %v2453_v57 = vld [vmem:[#allocation2 + $0x150] sm:$0xff]  ;;  %v2454_v28 = vld [vmem:[#allocation2 + $0x158] sm:$0xff] }
 0x2d5   : > { %v2525_v24 = vld [vmem:[%s4941_s3 + $0x150] sm:$0xff]  ;;  %v2526_v37 = vld [vmem:[%s4941_s3 + $0x158] sm:$0xff]  ;;  %v2455_v2 = vld [vmem:[#allocation2 + $0x160] sm:$0xff] }
 0x2d6   : > { %2666 = vst.msk [vmem:[%s4942_s4 + $0x138] sm:$0xff] %vm2334_vm2, %v2594_v53  ;;  %v2597_v51 = vadd.f32 %v2525_v24, %v2453_v57  ;;  %v2527_v43 = vld [vmem:[%s4941_s3 + $0x160] sm:$0xff]  ;;  %2667 = vst.msk [vmem:[%s4942_s4 + $0x140] sm:$0xff] %vm2334_vm2, %v2595_v29  ;;  %v2598_v36 = vadd.f32 %v2526_v37, %v2454_v28  ;;  %v2456_v49 = vld [vmem:[#allocation2 + $0x168] sm:$0xff] }
 0x2d7   : > { %2668 = vst.msk [vmem:[%s4942_s4 + $0x148] sm:$0xff] %vm2334_vm2, %v2596_v40  ;;  %v2599_v47 = vadd.f32 %v2527_v43, %v2455_v2  ;;  %v2528_v62 = vld [vmem:[%s4941_s3 + $0x168] sm:$0xff]  ;;  %v2457_v34 = vld [vmem:[#allocation2 + $0x170] sm:$0xff]  ;;  %v2458_v13 = vld [vmem:[#allocation2 + $0x178] sm:$0xff] }
 0x2d8   : > { %2669 = vst.msk [vmem:[%s4942_s4 + $0x150] sm:$0xff] %vm2334_vm2, %v2597_v51  ;;  %v2600_v21 = vadd.f32 %v2528_v62, %v2456_v49  ;;  %v2529_v56 = vld [vmem:[%s4941_s3 + $0x170] sm:$0xff]  ;;  %v2530_v9 = vld [vmem:[%s4941_s3 + $0x178] sm:$0xff]  ;;  %2670 = vst.msk [vmem:[%s4942_s4 + $0x158] sm:$0xff] %vm2334_vm2, %v2598_v36 }
 0x2d9   : > { %2671 = vst.msk [vmem:[%s4942_s4 + $0x160] sm:$0xff] %vm2334_vm2, %v2599_v47  ;;  %v2601_v48 = vadd.f32 %v2529_v56, %v2457_v34  ;;  %v2602_v59 = vadd.f32 %v2530_v9, %v2458_v13  ;;  %v2459_v11 = vld [vmem:[#allocation2 + $0x180] sm:$0xff]  ;;  %v2460_v25 = vld [vmem:[#allocation2 + $0x188] sm:$0xff]  ;;  %v2461_v26 = vld [vmem:[#allocation2 + $0x190] sm:$0xff] }
 0x2da   : > { %v2531_v12 = vld [vmem:[%s4941_s3 + $0x180] sm:$0xff]  ;;  %2672 = vst.msk [vmem:[%s4942_s4 + $0x168] sm:$0xff] %vm2334_vm2, %v2600_v21  ;;  %v2532_v17 = vld [vmem:[%s4941_s3 + $0x188] sm:$0xff]  ;;  %v2533_v61 = vld [vmem:[%s4941_s3 + $0x190] sm:$0xff] }
 0x2db   : > { %v2603_v31 = vadd.f32 %v2531_v12, %v2459_v11  ;;  %2673 = vst.msk [vmem:[%s4942_s4 + $0x170] sm:$0xff] %vm2334_vm2, %v2601_v48  ;;  %2674 = vst.msk [vmem:[%s4942_s4 + $0x178] sm:$0xff] %vm2334_vm2, %v2602_v59  ;;  %v2604_v35 = vadd.f32 %v2532_v17, %v2460_v25  ;;  %v2605_v27 = vadd.f32 %v2533_v61, %v2461_v26  ;;  %v2462_v5 = vld [vmem:[#allocation2 + $0x198] sm:$0xff]  ;;  %v2463_v58 = vld [vmem:[#allocation2 + $0x1a0] sm:$0xff] }
 0x2dc   : > { %v2534_v55 = vld [vmem:[%s4941_s3 + $0x198] sm:$0xff]  ;;  %v2535_v8 = vld [vmem:[%s4941_s3 + $0x1a0] sm:$0xff]  ;;  %v2464_v1 = vld [vmem:[#allocation2 + $0x1a8] sm:$0xff] }
 0x2dd   : > { %2675 = vst.msk [vmem:[%s4942_s4 + $0x180] sm:$0xff] %vm2334_vm2, %v2603_v31  ;;  %v2606_v63 = vadd.f32 %v2534_v55, %v2462_v5  ;;  %v2536_v38 = vld [vmem:[%s4941_s3 + $0x1a8] sm:$0xff]  ;;  %2676 = vst.msk [vmem:[%s4942_s4 + $0x188] sm:$0xff] %vm2334_vm2, %v2604_v35  ;;  %v2607_v30 = vadd.f32 %v2535_v8, %v2463_v58  ;;  %v2465_v45 = vld [vmem:[#allocation2 + $0x1b0] sm:$0xff] }
 0x2de   : > { %2677 = vst.msk [vmem:[%s4942_s4 + $0x190] sm:$0xff] %vm2334_vm2, %v2605_v27  ;;  %v2608_v4 = vadd.f32 %v2536_v38, %v2464_v1  ;;  %v2537_v10 = vld [vmem:[%s4941_s3 + $0x1b0] sm:$0xff]  ;;  %v2466_v0 = vld [vmem:[#allocation2 + $0x1b8] sm:$0xff]  ;;  %v2467_v14 = vld [vmem:[#allocation2 + $0x1c0] sm:$0xff] }
 0x2df   : > { %2678 = vst.msk [vmem:[%s4942_s4 + $0x198] sm:$0xff] %vm2334_vm2, %v2606_v63  ;;  %v2609_v23 = vadd.f32 %v2537_v10, %v2465_v45  ;;  %v2538_v33 = vld [vmem:[%s4941_s3 + $0x1b8] sm:$0xff]  ;;  %v2539_v60 = vld [vmem:[%s4941_s3 + $0x1c0] sm:$0xff]  ;;  %2679 = vst.msk [vmem:[%s4942_s4 + $0x1a0] sm:$0xff] %vm2334_vm2, %v2607_v30 }
 0x2e0   : > { %2680 = vst.msk [vmem:[%s4942_s4 + $0x1a8] sm:$0xff] %vm2334_vm2, %v2608_v4  ;;  %v2610_v39 = vadd.f32 %v2538_v33, %v2466_v0  ;;  %v2611_v44 = vadd.f32 %v2539_v60, %v2467_v14  ;;  %v2468_v7 = vld [vmem:[#allocation2 + $0x1c8] sm:$0xff]  ;;  %v2469_v41 = vld [vmem:[#allocation2 + $0x1d0] sm:$0xff]  ;;  %v2470_v6 = vld [vmem:[#allocation2 + $0x1d8] sm:$0xff] }
 0x2e1   : > { %v2540_v15 = vld [vmem:[%s4941_s3 + $0x1c8] sm:$0xff]  ;;  %2681 = vst.msk [vmem:[%s4942_s4 + $0x1b0] sm:$0xff] %vm2334_vm2, %v2609_v23  ;;  %v2541_v32 = vld [vmem:[%s4941_s3 + $0x1d0] sm:$0xff]  ;;  %v2542_v19 = vld [vmem:[%s4941_s3 + $0x1d8] sm:$0xff] }
 0x2e2   : > { %v2612_v18 = vadd.f32 %v2540_v15, %v2468_v7  ;;  %2682 = vst.msk [vmem:[%s4942_s4 + $0x1b8] sm:$0xff] %vm2334_vm2, %v2610_v39  ;;  %2683 = vst.msk [vmem:[%s4942_s4 + $0x1c0] sm:$0xff] %vm2334_vm2, %v2611_v44  ;;  %v2613_v3 = vadd.f32 %v2541_v32, %v2469_v41  ;;  %v2614_v16 = vadd.f32 %v2542_v19, %v2470_v6  ;;  %v2471_v22 = vld [vmem:[#allocation2 + $0x1e0] sm:$0xff]  ;;  %v2472_v20 = vld [vmem:[#allocation2 + $0x1e8] sm:$0xff] }
 0x2e3   : > { %v2543_v52 = vld [vmem:[%s4941_s3 + $0x1e0] sm:$0xff]  ;;  %v2544_v53 = vld [vmem:[%s4941_s3 + $0x1e8] sm:$0xff]  ;;  %v2473_v54 = vld [vmem:[#allocation2 + $0x1f0] sm:$0xff] }
 0x2e4   : > { %2684 = vst.msk [vmem:[%s4942_s4 + $0x1c8] sm:$0xff] %vm2334_vm2, %v2612_v18  ;;  %v2615_v50 = vadd.f32 %v2543_v52, %v2471_v22  ;;  %v2545_v46 = vld [vmem:[%s4941_s3 + $0x1f0] sm:$0xff]  ;;  %2685 = vst.msk [vmem:[%s4942_s4 + $0x1d0] sm:$0xff] %vm2334_vm2, %v2613_v3  ;;  %v2616_v42 = vadd.f32 %v2544_v53, %v2472_v20  ;;  %v2474_v40 = vld [vmem:[#allocation2 + $0x1f8] sm:$0xff] }
 0x2e5   : > { %2686 = vst.msk [vmem:[%s4942_s4 + $0x1d8] sm:$0xff] %vm2334_vm2, %v2614_v16  ;;  %v2617_v29 = vadd.f32 %v2545_v46, %v2473_v54  ;;  %v2546_v57 = vld [vmem:[%s4941_s3 + $0x1f8] sm:$0xff]  ;;  %v2475_v24 = vld [vmem:[#allocation2 + $0x200] sm:$0xff]  ;;  %v2476_v37 = vld [vmem:[#allocation2 + $0x208] sm:$0xff] }
 0x2e6   : > { %2687 = vst.msk [vmem:[%s4942_s4 + $0x1e0] sm:$0xff] %vm2334_vm2, %v2615_v50  ;;  %v2618_v28 = vadd.f32 %v2546_v57, %v2474_v40  ;;  %v2547_v51 = vld [vmem:[%s4941_s3 + $0x200] sm:$0xff]  ;;  %v2548_v2 = vld [vmem:[%s4941_s3 + $0x208] sm:$0xff]  ;;  %2688 = vst.msk [vmem:[%s4942_s4 + $0x1e8] sm:$0xff] %vm2334_vm2, %v2616_v42 }
 0x2e7   : > { %2689 = vst.msk [vmem:[%s4942_s4 + $0x1f0] sm:$0xff] %vm2334_vm2, %v2617_v29  ;;  %v2619_v43 = vadd.f32 %v2547_v51, %v2475_v24  ;;  %v2620_v36 = vadd.f32 %v2548_v2, %v2476_v37  ;;  %v2477_v47 = vld [vmem:[#allocation2 + $0x210] sm:$0xff]  ;;  %v2478_v62 = vld [vmem:[#allocation2 + $0x218] sm:$0xff]  ;;  %v2479_v56 = vld [vmem:[#allocation2 + $0x220] sm:$0xff] }
 0x2e8   : > { %v2549_v49 = vld [vmem:[%s4941_s3 + $0x210] sm:$0xff]  ;;  %2690 = vst.msk [vmem:[%s4942_s4 + $0x1f8] sm:$0xff] %vm2334_vm2, %v2618_v28  ;;  %v2550_v21 = vld [vmem:[%s4941_s3 + $0x218] sm:$0xff]  ;;  %v2551_v13 = vld [vmem:[%s4941_s3 + $0x220] sm:$0xff] }
 0x2e9   : > { %v2621_v34 = vadd.f32 %v2549_v49, %v2477_v47  ;;  %2691 = vst.msk [vmem:[%s4942_s4 + $0x200] sm:$0xff] %vm2334_vm2, %v2619_v43  ;;  %2692 = vst.msk [vmem:[%s4942_s4 + $0x208] sm:$0xff] %vm2334_vm2, %v2620_v36  ;;  %v2622_v9 = vadd.f32 %v2550_v21, %v2478_v62  ;;  %v2623_v48 = vadd.f32 %v2551_v13, %v2479_v56  ;;  %v2480_v59 = vld [vmem:[#allocation2 + $0x228] sm:$0xff]  ;;  %v2481_v12 = vld [vmem:[#allocation2 + $0x230] sm:$0xff] }
 0x2ea   : > { %v2552_v11 = vld [vmem:[%s4941_s3 + $0x228] sm:$0xff]  ;;  %v2553_v31 = vld [vmem:[%s4941_s3 + $0x230] sm:$0xff]  ;;  %v2482_v17 = vld [vmem:[#allocation2 + $0x238] sm:$0xff] }
 0x2eb   : > { %2693 = vst.msk [vmem:[%s4942_s4 + $0x210] sm:$0xff] %vm2334_vm2, %v2621_v34  ;;  %v2624_v25 = vadd.f32 %v2552_v11, %v2480_v59  ;;  %v2554_v26 = vld [vmem:[%s4941_s3 + $0x238] sm:$0xff]  ;;  %2694 = vst.msk [vmem:[%s4942_s4 + $0x218] sm:$0xff] %vm2334_vm2, %v2622_v9  ;;  %v2625_v61 = vadd.f32 %v2553_v31, %v2481_v12 }
 0x2ec   : > { %2695 = vst.msk [vmem:[%s4942_s4 + $0x220] sm:$0xff] %vm2334_vm2, %v2623_v48  ;;  %v2626_v35 = vadd.f32 %v2554_v26, %v2482_v17 }
 0x2ed   : > { %2696 = vst.msk [vmem:[%s4942_s4 + $0x228] sm:$0xff] %vm2334_vm2, %v2624_v25  ;;  %2697 = vst.msk [vmem:[%s4942_s4 + $0x230] sm:$0xff] %vm2334_vm2, %v2625_v61 }
 0x2ee   : > { %2698 = vst.msk [vmem:[%s4942_s4 + $0x238] sm:$0xff] %vm2334_vm2, %v2626_v35 }
 0x2ef PF: > { %s14_s17 = sadd.s32 1, %s3312_s17   ;;  %s4951_s15 = smov %s3308_s16 }
 0x2f0   : > { %p11_p8 = scmp.ge.s32.totalorder %s14_s17, 4   ;;  %s4952_s16 = smov %s4954_s18 }
 0x2f2   :  { %13 = sbr.rel (!%p11_p8) target bundleno = 2 (0x2), region = 83 }

</bundles_post_ra>
